<compile_context>
chip_gen: v5e
topology: v5e:2x2
jax: 0.10.0
libtpu: 0.0.40
codegen_flags: <defaults>
</compile_context>

<pallas_src>
import functools

import jax
import jax.numpy as jnp
from jax import lax
from jax.experimental import pallas as pl
from jax.experimental.pallas import tpu as pltpu


# ---------------------------------------------------------------------------
# Single fused kernel for the whole Block (one grid step per image group).
#
# Ref order: x(Cin,NL), mask01(9,NL), [sel(NL,NLo)], (wf2_i, shift_i) per
#            layer, [wskip_T, sshift], out(Cout,NLo), taps scratch.
# Static config (functools.partial): relu_flags, roll_shifts, stride, has_skip.
# ---------------------------------------------------------------------------
def _block_kernel(*refs, relu_flags, roll_shifts, stride, has_skip):
    n_layers = len(relu_flags)
    idx = 0
    x_ref = refs[idx]; idx += 1
    mask_ref = refs[idx]; idx += 1
    sel_ref = None
    if stride != 1:
        sel_ref = refs[idx]; idx += 1
    layer_refs = []
    for _ in range(n_layers):
        layer_refs.append((refs[idx], refs[idx + 1]))
        idx += 2
    wskip_ref = sshift_ref = None
    if has_skip:
        wskip_ref = refs[idx]; sshift_ref = refs[idx + 1]; idx += 2
    o_ref = refs[idx]; idx += 1
    taps_ref = refs[idx]                       # (9*max_cin, NL) VMEM scratch

    x = x_ref[...]                             # (Cin, NL)  lane-dense f32
    mask = mask_ref[...]                       # (9, NL)    loaded once

    def roll_tap(y, t):
        s = roll_shifts[t]
        return pltpu.roll(y, s, axis=1) if s else y

    # --- rep branch: [ReLU] -> (depthwise3x3 . pointwise1x1 . BN-scale) as a
    #     SINGLE K=9*Cin MXU matmul per layer; taps streamed through scratch.
    y = x
    for i in range(n_layers):
        wf_ref, shift_ref = layer_refs[i]
        ci = wf_ref.shape[1] // 9
        if relu_flags[i]:
            y = jnp.maximum(y, 0.0)
        for t in range(9):
            taps_ref[t * ci:(t + 1) * ci, :] = roll_tap(y, t) * mask[t:t + 1, :]
        y = (jnp.dot(wf_ref[...], taps_ref[0:9 * ci, :],
                     preferred_element_type=jnp.float32)
             + shift_ref[...])                 # folded BN affine

    # --- skip branch at FULL resolution (tiny K=Cin matmul + folded BN).
    if has_skip:
        skip = (jnp.dot(wskip_ref[...], x, preferred_element_type=jnp.float32)
                + sshift_ref[...])
    else:
        skip = x                               # requires Cin==Cout, stride==1

    # --- MaxPool2d(3, stride, pad=1) over the same rolled taps, then ONE
    #     shared one-hot selection matmul for pool-subsample + skip-stride.
    if stride != 1:
        m = None
        for t in range(9):
            tap = jnp.where(mask[t:t + 1, :] != 0.0, roll_tap(y, t), -3.0e38)
            m = tap if m is None else jnp.maximum(m, tap)
        o_ref[...] = jnp.dot(m + skip, sel_ref[...],
                             preferred_element_type=jnp.float32)
    else:
        o_ref[...] = y + skip


# ---------------------------------------------------------------------------
# Block forward: NCHW in / NCHW out; all compute in a single pallas_call.
# grid_steps=1 is best on v5e/v6e (single TensorCore); use grid_steps=2 on
# v7x to split the folded batch across its two cores.
# ---------------------------------------------------------------------------
def block_forward(x_nchw, params, strides, *, grid_steps=1):
    assert strides in (1, 2)
    N, Cin, H, W = x_nchw.shape
    assert N % grid_steps == 0
    Npg = N // grid_steps
    L = H * W
    NL = Npg * L
    if strides != 1:
        Ho = (H + 2 - 3) // strides + 1
        Wo = (W + 2 - 3) // strides + 1
    else:
        Ho, Wo = H, W
    Lo = Ho * Wo
    NLo = Npg * Lo

    # Channel-major with batch folded into the lane axis: (G, Cin, Npg*L).
    x2 = (x_nchw.astype(jnp.float32)
          .reshape(grid_steps, Npg, Cin, L)
          .transpose(0, 2, 1, 3)
          .reshape(grid_steps, Cin, NL))

    # Static tap geometry: flat lane shift (mod Npg*L, so image-seam wrap is
    # handled by the per-image border mask) + validity mask per 3x3 tap.
    ii = jnp.arange(H)
    jj = jnp.arange(W)
    masks, roll_shifts = [], []
    for kh in range(3):
        for kw in range(3):
            dh, dw = kh - 1, kw - 1
            valid = (((ii + dh >= 0) & (ii + dh < H))[:, None]
                     & ((jj + dw >= 0) & (jj + dw < W))[None, :])
            masks.append(valid.reshape(L))
            roll_shifts.append((-(dh * W + dw)) % NL)
    mask01 = jnp.tile(jnp.stack(masks).astype(jnp.float32), (1, Npg))  # (9, NL)
    roll_shifts = tuple(roll_shifts)

    args = [x2, mask01]
    specs = [pl.BlockSpec((pl.Squeezed(), Cin, NL), lambda g: (g, 0, 0)),
             pl.BlockSpec((9, NL), lambda g: (0, 0))]

    # One-hot selection matrix for the stride-2 subsample (pool + skip), block
    # diagonal over the folded images.
    if strides != 1:
        oi = jnp.arange(Ho)
        oj = jnp.arange(Wo)
        centers = (strides * oi[:, None] * W + strides * oj[None, :]).reshape(-1)
        centers_full = (jnp.arange(Npg)[:, None] * L + centers[None, :]).reshape(-1)
        sel = (jnp.arange(NL)[:, None] == centers_full[None, :]).astype(jnp.float32)
        args.append(sel)
        specs.append(pl.BlockSpec((NL, NLo), lambda g: (0, 0)))

    # Per-layer fused weights: depthwise x pointwise x BN-scale, flattened to
    # (Cout, 9*Cin) so each layer is one MXU matmul; BN shift as (Cout, 1).
    relu_flags = []
    max_cin = Cin
    last_cout = Cin
    for lyr in params["layers"]:
        wdw, wpw = lyr["wdw"], lyr["wpw"]
        scale, shift = lyr["bn"]
        ci, co = wpw.shape
        max_cin = max(max_cin, ci)
        wf = jnp.einsum("tc,cd->tdc", wdw.reshape(9, ci), wpw)      # (9,Cout,Cin)
        wf = wf * scale[None, :, None]
        wf2 = wf.transpose(1, 0, 2).reshape(co, 9 * ci)             # (Cout,9*Cin)
        args += [wf2, shift.reshape(co, 1)]
        specs += [pl.BlockSpec((co, 9 * ci), lambda g: (0, 0)),
                  pl.BlockSpec((co, 1), lambda g: (0, 0))]
        relu_flags.append(bool(lyr["relu"]))
        last_cout = co

    has_skip = params["skip"] is not None
    if has_skip:
        wskip, sscale, sshift = params["skip"]
        co = wskip.shape[1]
        wskip_t = wskip.T * sscale[:, None]                # (Cout, Cin), scale folded
        args += [wskip_t, sshift.reshape(co, 1)]
        specs += [pl.BlockSpec((co, Cin), lambda g: (0, 0)),
                  pl.BlockSpec((co, 1), lambda g: (0, 0))]
        Cout = co
    else:
        assert last_cout == Cin and strides == 1, \
            "identity skip requires Cin == Cout and stride == 1"
        Cout = last_cout

    kern = functools.partial(_block_kernel,
                             relu_flags=tuple(relu_flags),
                             roll_shifts=roll_shifts,
                             stride=strides,
                             has_skip=has_skip)
    out = pl.pallas_call(
        kern,
        out_shape=jax.ShapeDtypeStruct((grid_steps, Cout, NLo), jnp.float32),
        grid=(grid_steps,),
        in_specs=specs,
        out_specs=pl.BlockSpec((pl.Squeezed(), Cout, NLo), lambda g: (g, 0, 0)),
        scratch_shapes=[pltpu.VMEM((9 * max_cin, NL), jnp.float32)],
        compiler_params=pltpu.CompilerParams(dimension_semantics=("parallel",)),
    )(*args)

    # (G, Cout, Npg*Lo) -> NCHW
    out = (out.reshape(grid_steps, Cout, Npg, Ho, Wo)
              .transpose(0, 2, 1, 3, 4)
              .reshape(N, Cout, Ho, Wo))
    return out


# ---------------------------------------------------------------------------
# Parameter construction (deterministic, mirrors Block.__init__ shapes).
# ---------------------------------------------------------------------------
def _bn_affine(key, c, eps=1e-5):
    k1, k2, k3, k4 = jax.random.split(key, 4)
    gamma = 1.0 + 0.1 * jax.random.normal(k1, (c,), jnp.float32)
    beta = 0.1 * jax.random.normal(k2, (c,), jnp.float32)
    mean = 0.1 * jax.random.normal(k3, (c,), jnp.float32)
    var = jnp.abs(jax.random.normal(k4, (c,), jnp.float32)) + 0.5
    scale = gamma / jnp.sqrt(var + eps)
    shift = beta - mean * scale
    return scale, shift


def init_block_params(key, in_filters, out_filters, reps, strides=1,
                      start_with_relu=True, grow_first=True):
    specs = []
    filters = in_filters
    if grow_first:
        specs.append(dict(relu=start_with_relu, cin=in_filters, cout=out_filters))
        filters = out_filters
    for _ in range(reps - 1):
        specs.append(dict(relu=True, cin=filters, cout=filters))
    if not grow_first:
        specs.append(dict(relu=True, cin=in_filters, cout=out_filters))

    layers = []
    for s in specs:
        key, kd, kp, kb = jax.random.split(key, 4)
        layers.append(dict(
            relu=s["relu"],
            wdw=0.3 * jax.random.normal(kd, (3, 3, s["cin"]), jnp.float32),
            wpw=0.3 * jax.random.normal(kp, (s["cin"], s["cout"]), jnp.float32),
            bn=_bn_affine(kb, s["cout"]),
        ))

    skip = None
    if out_filters != in_filters or strides != 1:
        key, ks, kb = jax.random.split(key, 3)
        skip = (0.3 * jax.random.normal(ks, (in_filters, out_filters), jnp.float32),
                *_bn_affine(kb, out_filters))
    return dict(layers=layers, skip=skip), strides


# ---------------------------------------------------------------------------
# Pure-JAX reference (for correctness check of the Pallas kernel).
# ---------------------------------------------------------------------------
def ref_block(x_nchw, params, strides):
    x = jnp.transpose(x_nchw, (0, 2, 3, 1)).astype(jnp.float32)   # NHWC
    y = x
    for lyr in params["layers"]:
        if lyr["relu"]:
            y = jnp.maximum(y, 0.0)
        cin = lyr["wdw"].shape[-1]
        dw = lyr["wdw"][:, :, None, :]                            # HWIO, groups=cin
        y = lax.conv_general_dilated(
            y, dw, (1, 1), [(1, 1), (1, 1)],
            dimension_numbers=("NHWC", "HWIO", "NHWC"),
            feature_group_count=cin)
        y = jnp.einsum("nhwc,cd->nhwd", y, lyr["wpw"])
        scale, shift = lyr["bn"]
        y = y * scale + shift
    if params["skip"] is not None:
        wskip, sscale, sshift = params["skip"]
        skip = jnp.einsum("nhwc,cd->nhwd", x[:, ::strides, ::strides, :], wskip)
        skip = skip * sscale + sshift
    else:
        skip = x
    if strides != 1:
        y = lax.reduce_window(y, -jnp.inf, lax.max,
                              (1, 3, 3, 1), (1, strides, strides, 1),
                              [(0, 0), (1, 1), (1, 1), (0, 0)])
    out = y + skip
    return jnp.transpose(out, (0, 3, 1, 2))                       # NCHW


if __name__ == "__main__":
    key = jax.random.PRNGKey(0)
    kx, kp = jax.random.split(key)

    # Small shapes: N=2, in_filters=4, H=W=16 (NCHW, matching the torch module).
    x = jax.random.normal(kx, (2, 4, 16, 16), jnp.float32)
    params, strides = init_block_params(
        kp, in_filters=4, out_filters=8, reps=2, strides=2,
        start_with_relu=True, grow_first=True)

    out = jax.block_until_ready(block_forward(x, params, strides))
    ref = jax.block_until_ready(ref_block(x, params, strides))

    assert out.shape == ref.shape == (2, 8, 8, 8), out.shape
    err = float(jnp.max(jnp.abs(out - ref)))
    assert jnp.allclose(out, ref, rtol=1e-3, atol=1e-3), f"max abs err = {err}"

    print("KERNEL_OK")
</pallas_src>

<mosaic_0001>
module attributes {stable_mosaic.version = 11 : i64} {
  func.func @_block_kernel(%arg0: i32, %arg1: memref<1x4x512xf32, #tpu.memory_space<vmem>>, %arg2: memref<9x512xf32, #tpu.memory_space<vmem>>, %arg3: memref<512x128xf32, #tpu.memory_space<vmem>>, %arg4: memref<8x36xf32, #tpu.memory_space<vmem>>, %arg5: memref<8x1xf32, #tpu.memory_space<vmem>>, %arg6: memref<8x72xf32, #tpu.memory_space<vmem>>, %arg7: memref<8x1xf32, #tpu.memory_space<vmem>>, %arg8: memref<8x4xf32, #tpu.memory_space<vmem>>, %arg9: memref<8x1xf32, #tpu.memory_space<vmem>>, %arg10: memref<1x8x128xf32, #tpu.memory_space<vmem>>, %arg11: memref<72x512xf32, #tpu.memory_space<vmem>>) attributes {dimension_semantics = [#tpu.dimension_semantics<parallel>], iteration_bounds = array<i64: 1>, scalar_prefetch = 0 : i64, scratch_operands = 1 : i64, tpu.core_type = #tpu.core_type<tc>, window_params = [{transform_indices = @transform_0, window_bounds = array<i64: 1, 4, 512>}, {pipeline_mode = #tpu.pipeline_mode<synchronous>, transform_indices = @transform_1, window_bounds = array<i64: 9, 512>}, {pipeline_mode = #tpu.pipeline_mode<synchronous>, transform_indices = @transform_2, window_bounds = array<i64: 512, 128>}, {pipeline_mode = #tpu.pipeline_mode<synchronous>, transform_indices = @transform_3, window_bounds = array<i64: 8, 36>}, {pipeline_mode = #tpu.pipeline_mode<synchronous>, transform_indices = @transform_4, window_bounds = array<i64: 8, 1>}, {pipeline_mode = #tpu.pipeline_mode<synchronous>, transform_indices = @transform_5, window_bounds = array<i64: 8, 72>}, {pipeline_mode = #tpu.pipeline_mode<synchronous>, transform_indices = @transform_6, window_bounds = array<i64: 8, 1>}, {pipeline_mode = #tpu.pipeline_mode<synchronous>, transform_indices = @transform_7, window_bounds = array<i64: 8, 4>}, {pipeline_mode = #tpu.pipeline_mode<synchronous>, transform_indices = @transform_8, window_bounds = array<i64: 8, 1>}, {transform_indices = @transform_9, window_bounds = array<i64: 1, 8, 128>}]} {
    %c0 = arith.constant 0 : index
    %c0_0 = arith.constant 0 : index
    %c0_1 = arith.constant 0 : index
    %0 = vector.load %arg1[%c0, %c0_0, %c0_1] : memref<1x4x512xf32, #tpu.memory_space<vmem>>, vector<1x4x512xf32>
    %1 = vector.shape_cast %0 : vector<1x4x512xf32> to vector<4x512xf32>
    %c0_2 = arith.constant 0 : index
    %c0_3 = arith.constant 0 : index
    %2 = vector.load %arg2[%c0_2, %c0_3] : memref<9x512xf32, #tpu.memory_space<vmem>>, vector<9x512xf32>
    %cst = arith.constant 0.000000e+00 : f32
    %3 = vector.broadcast %cst : f32 to vector<4x512xf32>
    %4 = arith.maximumf %1, %3 : vector<4x512xf32>
    %c17_i32 = arith.constant 17 : i32
    %5 = tpu.dynamic_rotate %4 by %c17_i32 dim 1 : vector<4x512xf32>, i32 -> vector<4x512xf32>
    %6 = vector.extract_strided_slice %2 {offsets = [0, 0], sizes = [1, 512], strides = [1, 1]} : vector<9x512xf32> to vector<1x512xf32>
    %7 = vector.broadcast %6 : vector<1x512xf32> to vector<4x512xf32>
    %8 = arith.mulf %5, %7 : vector<4x512xf32>
    %c0_4 = arith.constant 0 : index
    %c0_5 = arith.constant 0 : index
    %9 = vector.load %arg11[%c0_4, %c0_5] : memref<72x512xf32, #tpu.memory_space<vmem>>, vector<4x512xf32>
    tpu.vector_store %arg11[%c0_4, %c0_5], %8 {strides = array<i32>} : memref<72x512xf32, #tpu.memory_space<vmem>>, vector<4x512xf32>,
    %c16_i32 = arith.constant 16 : i32
    %10 = tpu.dynamic_rotate %4 by %c16_i32 dim 1 : vector<4x512xf32>, i32 -> vector<4x512xf32>
    %11 = vector.extract_strided_slice %2 {offsets = [1, 0], sizes = [1, 512], strides = [1, 1]} : vector<9x512xf32> to vector<1x512xf32>
    %12 = vector.broadcast %11 : vector<1x512xf32> to vector<4x512xf32>
    %13 = arith.mulf %10, %12 : vector<4x512xf32>
    %c4 = arith.constant 4 : index
    %c0_6 = arith.constant 0 : index
    %14 = vector.load %arg11[%c4, %c0_6] : memref<72x512xf32, #tpu.memory_space<vmem>>, vector<4x512xf32>
    tpu.vector_store %arg11[%c4, %c0_6], %13 {strides = array<i32>} : memref<72x512xf32, #tpu.memory_space<vmem>>, vector<4x512xf32>,
    %c15_i32 = arith.constant 15 : i32
    %15 = tpu.dynamic_rotate %4 by %c15_i32 dim 1 : vector<4x512xf32>, i32 -> vector<4x512xf32>
    %16 = vector.extract_strided_slice %2 {offsets = [2, 0], sizes = [1, 512], strides = [1, 1]} : vector<9x512xf32> to vector<1x512xf32>
    %17 = vector.broadcast %16 : vector<1x512xf32> to vector<4x512xf32>
    %18 = arith.mulf %15, %17 : vector<4x512xf32>
    %c8 = arith.constant 8 : index
    %c0_7 = arith.constant 0 : index
    %19 = vector.load %arg11[%c8, %c0_7] : memref<72x512xf32, #tpu.memory_space<vmem>>, vector<4x512xf32>
    tpu.vector_store %arg11[%c8, %c0_7], %18 {strides = array<i32>} : memref<72x512xf32, #tpu.memory_space<vmem>>, vector<4x512xf32>,
    %c1_i32 = arith.constant 1 : i32
    %20 = tpu.dynamic_rotate %4 by %c1_i32 dim 1 : vector<4x512xf32>, i32 -> vector<4x512xf32>
    %21 = vector.extract_strided_slice %2 {offsets = [3, 0], sizes = [1, 512], strides = [1, 1]} : vector<9x512xf32> to vector<1x512xf32>
    %22 = vector.broadcast %21 : vector<1x512xf32> to vector<4x512xf32>
    %23 = arith.mulf %20, %22 : vector<4x512xf32>
    %c12 = arith.constant 12 : index
    %c0_8 = arith.constant 0 : index
    %24 = vector.load %arg11[%c12, %c0_8] : memref<72x512xf32, #tpu.memory_space<vmem>>, vector<4x512xf32>
    tpu.vector_store %arg11[%c12, %c0_8], %23 {strides = array<i32>} : memref<72x512xf32, #tpu.memory_space<vmem>>, vector<4x512xf32>,
    %25 = vector.extract_strided_slice %2 {offsets = [4, 0], sizes = [1, 512], strides = [1, 1]} : vector<9x512xf32> to vector<1x512xf32>
    %26 = vector.broadcast %25 : vector<1x512xf32> to vector<4x512xf32>
    %27 = arith.mulf %4, %26 : vector<4x512xf32>
    %c16 = arith.constant 16 : index
    %c0_9 = arith.constant 0 : index
    %28 = vector.load %arg11[%c16, %c0_9] : memref<72x512xf32, #tpu.memory_space<vmem>>, vector<4x512xf32>
    tpu.vector_store %arg11[%c16, %c0_9], %27 {strides = array<i32>} : memref<72x512xf32, #tpu.memory_space<vmem>>, vector<4x512xf32>,
    %c511_i32 = arith.constant 511 : i32
    %29 = tpu.dynamic_rotate %4 by %c511_i32 dim 1 : vector<4x512xf32>, i32 -> vector<4x512xf32>
    %30 = vector.extract_strided_slice %2 {offsets = [5, 0], sizes = [1, 512], strides = [1, 1]} : vector<9x512xf32> to vector<1x512xf32>
    %31 = vector.broadcast %30 : vector<1x512xf32> to vector<4x512xf32>
    %32 = arith.mulf %29, %31 : vector<4x512xf32>
    %c20 = arith.constant 20 : index
    %c0_10 = arith.constant 0 : index
    %33 = vector.load %arg11[%c20, %c0_10] : memref<72x512xf32, #tpu.memory_space<vmem>>, vector<4x512xf32>
    tpu.vector_store %arg11[%c20, %c0_10], %32 {strides = array<i32>} : memref<72x512xf32, #tpu.memory_space<vmem>>, vector<4x512xf32>,
    %c497_i32 = arith.constant 497 : i32
    %34 = tpu.dynamic_rotate %4 by %c497_i32 dim 1 : vector<4x512xf32>, i32 -> vector<4x512xf32>
    %35 = vector.extract_strided_slice %2 {offsets = [6, 0], sizes = [1, 512], strides = [1, 1]} : vector<9x512xf32> to vector<1x512xf32>
    %36 = vector.broadcast %35 : vector<1x512xf32> to vector<4x512xf32>
    %37 = arith.mulf %34, %36 : vector<4x512xf32>
    %c24 = arith.constant 24 : index
    %c0_11 = arith.constant 0 : index
    %38 = vector.load %arg11[%c24, %c0_11] : memref<72x512xf32, #tpu.memory_space<vmem>>, vector<4x512xf32>
    tpu.vector_store %arg11[%c24, %c0_11], %37 {strides = array<i32>} : memref<72x512xf32, #tpu.memory_space<vmem>>, vector<4x512xf32>,
    %c496_i32 = arith.constant 496 : i32
    %39 = tpu.dynamic_rotate %4 by %c496_i32 dim 1 : vector<4x512xf32>, i32 -> vector<4x512xf32>
    %40 = vector.extract_strided_slice %2 {offsets = [7, 0], sizes = [1, 512], strides = [1, 1]} : vector<9x512xf32> to vector<1x512xf32>
    %41 = vector.broadcast %40 : vector<1x512xf32> to vector<4x512xf32>
    %42 = arith.mulf %39, %41 : vector<4x512xf32>
    %c28 = arith.constant 28 : index
    %c0_12 = arith.constant 0 : index
    %43 = vector.load %arg11[%c28, %c0_12] : memref<72x512xf32, #tpu.memory_space<vmem>>, vector<4x512xf32>
    tpu.vector_store %arg11[%c28, %c0_12], %42 {strides = array<i32>} : memref<72x512xf32, #tpu.memory_space<vmem>>, vector<4x512xf32>,
    %c495_i32 = arith.constant 495 : i32
    %44 = tpu.dynamic_rotate %4 by %c495_i32 dim 1 : vector<4x512xf32>, i32 -> vector<4x512xf32>
    %45 = vector.extract_strided_slice %2 {offsets = [8, 0], sizes = [1, 512], strides = [1, 1]} : vector<9x512xf32> to vector<1x512xf32>
    %46 = vector.broadcast %45 : vector<1x512xf32> to vector<4x512xf32>
    %47 = arith.mulf %44, %46 : vector<4x512xf32>
    %c32 = arith.constant 32 : index
    %c0_13 = arith.constant 0 : index
    %48 = vector.load %arg11[%c32, %c0_13] : memref<72x512xf32, #tpu.memory_space<vmem>>, vector<4x512xf32>
    tpu.vector_store %arg11[%c32, %c0_13], %47 {strides = array<i32>} : memref<72x512xf32, #tpu.memory_space<vmem>>, vector<4x512xf32>,
    %c0_14 = arith.constant 0 : index
    %c0_15 = arith.constant 0 : index
    %49 = vector.load %arg4[%c0_14, %c0_15] : memref<8x36xf32, #tpu.memory_space<vmem>>, vector<8x36xf32>
    %c0_16 = arith.constant 0 : index
    %c0_17 = arith.constant 0 : index
    %50 = vector.load %arg11[%c0_16, %c0_17] : memref<72x512xf32, #tpu.memory_space<vmem>>, vector<36x512xf32>
    %cst_18 = arith.constant dense<0.000000e+00> : vector<8x512xf32>
    %51 = tpu.matmul %49, %50, %cst_18 {dimension_numbers = #tpu.dot_dimension_numbers<[1], [0], [0], [1], [0, 0, 1, 1], [], []>} : vector<8x36xf32>, vector<36x512xf32>, vector<8x512xf32> -> vector<8x512xf32>
    %c0_19 = arith.constant 0 : index
    %c0_20 = arith.constant 0 : index
    %52 = vector.load %arg5[%c0_19, %c0_20] : memref<8x1xf32, #tpu.memory_space<vmem>>, vector<8x1xf32>
    %53 = vector.broadcast %52 : vector<8x1xf32> to vector<8x512xf32>
    %54 = arith.addf %51, %53 : vector<8x512xf32>
    %cst_21 = arith.constant 0.000000e+00 : f32
    %55 = vector.broadcast %cst_21 : f32 to vector<8x512xf32>
    %56 = arith.maximumf %54, %55 : vector<8x512xf32>
    %c17_i32_22 = arith.constant 17 : i32
    %57 = tpu.dynamic_rotate %56 by %c17_i32_22 dim 1 : vector<8x512xf32>, i32 -> vector<8x512xf32>
    %58 = vector.extract_strided_slice %2 {offsets = [0, 0], sizes = [1, 512], strides = [1, 1]} : vector<9x512xf32> to vector<1x512xf32>
    %59 = vector.broadcast %58 : vector<1x512xf32> to vector<8x512xf32>
    %60 = arith.mulf %57, %59 : vector<8x512xf32>
    %c0_23 = arith.constant 0 : index
    %c0_24 = arith.constant 0 : index
    %61 = vector.load %arg11[%c0_23, %c0_24] : memref<72x512xf32, #tpu.memory_space<vmem>>, vector<8x512xf32>
    tpu.vector_store %arg11[%c0_23, %c0_24], %60 {strides = array<i32>} : memref<72x512xf32, #tpu.memory_space<vmem>>, vector<8x512xf32>,
    %c16_i32_25 = arith.constant 16 : i32
    %62 = tpu.dynamic_rotate %56 by %c16_i32_25 dim 1 : vector<8x512xf32>, i32 -> vector<8x512xf32>
    %63 = vector.extract_strided_slice %2 {offsets = [1, 0], sizes = [1, 512], strides = [1, 1]} : vector<9x512xf32> to vector<1x512xf32>
    %64 = vector.broadcast %63 : vector<1x512xf32> to vector<8x512xf32>
    %65 = arith.mulf %62, %64 : vector<8x512xf32>
    %c8_26 = arith.constant 8 : index
    %c0_27 = arith.constant 0 : index
    %66 = vector.load %arg11[%c8_26, %c0_27] : memref<72x512xf32, #tpu.memory_space<vmem>>, vector<8x512xf32>
    tpu.vector_store %arg11[%c8_26, %c0_27], %65 {strides = array<i32>} : memref<72x512xf32, #tpu.memory_space<vmem>>, vector<8x512xf32>,
    %c15_i32_28 = arith.constant 15 : i32
    %67 = tpu.dynamic_rotate %56 by %c15_i32_28 dim 1 : vector<8x512xf32>, i32 -> vector<8x512xf32>
    %68 = vector.extract_strided_slice %2 {offsets = [2, 0], sizes = [1, 512], strides = [1, 1]} : vector<9x512xf32> to vector<1x512xf32>
    %69 = vector.broadcast %68 : vector<1x512xf32> to vector<8x512xf32>
    %70 = arith.mulf %67, %69 : vector<8x512xf32>
    %c16_29 = arith.constant 16 : index
    %c0_30 = arith.constant 0 : index
    %71 = vector.load %arg11[%c16_29, %c0_30] : memref<72x512xf32, #tpu.memory_space<vmem>>, vector<8x512xf32>
    tpu.vector_store %arg11[%c16_29, %c0_30], %70 {strides = array<i32>} : memref<72x512xf32, #tpu.memory_space<vmem>>, vector<8x512xf32>,
    %c1_i32_31 = arith.constant 1 : i32
    %72 = tpu.dynamic_rotate %56 by %c1_i32_31 dim 1 : vector<8x512xf32>, i32 -> vector<8x512xf32>
    %73 = vector.extract_strided_slice %2 {offsets = [3, 0], sizes = [1, 512], strides = [1, 1]} : vector<9x512xf32> to vector<1x512xf32>
    %74 = vector.broadcast %73 : vector<1x512xf32> to vector<8x512xf32>
    %75 = arith.mulf %72, %74 : vector<8x512xf32>
    %c24_32 = arith.constant 24 : index
    %c0_33 = arith.constant 0 : index
    %76 = vector.load %arg11[%c24_32, %c0_33] : memref<72x512xf32, #tpu.memory_space<vmem>>, vector<8x512xf32>
    tpu.vector_store %arg11[%c24_32, %c0_33], %75 {strides = array<i32>} : memref<72x512xf32, #tpu.memory_space<vmem>>, vector<8x512xf32>,
    %77 = vector.extract_strided_slice %2 {offsets = [4, 0], sizes = [1, 512], strides = [1, 1]} : vector<9x512xf32> to vector<1x512xf32>
    %78 = vector.broadcast %77 : vector<1x512xf32> to vector<8x512xf32>
    %79 = arith.mulf %56, %78 : vector<8x512xf32>
    %c32_34 = arith.constant 32 : index
    %c0_35 = arith.constant 0 : index
    %80 = vector.load %arg11[%c32_34, %c0_35] : memref<72x512xf32, #tpu.memory_space<vmem>>, vector<8x512xf32>
    tpu.vector_store %arg11[%c32_34, %c0_35], %79 {strides = array<i32>} : memref<72x512xf32, #tpu.memory_space<vmem>>, vector<8x512xf32>,
    %c511_i32_36 = arith.constant 511 : i32
    %81 = tpu.dynamic_rotate %56 by %c511_i32_36 dim 1 : vector<8x512xf32>, i32 -> vector<8x512xf32>
    %82 = vector.extract_strided_slice %2 {offsets = [5, 0], sizes = [1, 512], strides = [1, 1]} : vector<9x512xf32> to vector<1x512xf32>
    %83 = vector.broadcast %82 : vector<1x512xf32> to vector<8x512xf32>
    %84 = arith.mulf %81, %83 : vector<8x512xf32>
    %c40 = arith.constant 40 : index
    %c0_37 = arith.constant 0 : index
    %85 = vector.load %arg11[%c40, %c0_37] : memref<72x512xf32, #tpu.memory_space<vmem>>, vector<8x512xf32>
    tpu.vector_store %arg11[%c40, %c0_37], %84 {strides = array<i32>} : memref<72x512xf32, #tpu.memory_space<vmem>>, vector<8x512xf32>,
    %c497_i32_38 = arith.constant 497 : i32
    %86 = tpu.dynamic_rotate %56 by %c497_i32_38 dim 1 : vector<8x512xf32>, i32 -> vector<8x512xf32>
    %87 = vector.extract_strided_slice %2 {offsets = [6, 0], sizes = [1, 512], strides = [1, 1]} : vector<9x512xf32> to vector<1x512xf32>
    %88 = vector.broadcast %87 : vector<1x512xf32> to vector<8x512xf32>
    %89 = arith.mulf %86, %88 : vector<8x512xf32>
    %c48 = arith.constant 48 : index
    %c0_39 = arith.constant 0 : index
    %90 = vector.load %arg11[%c48, %c0_39] : memref<72x512xf32, #tpu.memory_space<vmem>>, vector<8x512xf32>
    tpu.vector_store %arg11[%c48, %c0_39], %89 {strides = array<i32>} : memref<72x512xf32, #tpu.memory_space<vmem>>, vector<8x512xf32>,
    %c496_i32_40 = arith.constant 496 : i32
    %91 = tpu.dynamic_rotate %56 by %c496_i32_40 dim 1 : vector<8x512xf32>, i32 -> vector<8x512xf32>
    %92 = vector.extract_strided_slice %2 {offsets = [7, 0], sizes = [1, 512], strides = [1, 1]} : vector<9x512xf32> to vector<1x512xf32>
    %93 = vector.broadcast %92 : vector<1x512xf32> to vector<8x512xf32>
    %94 = arith.mulf %91, %93 : vector<8x512xf32>
    %c56 = arith.constant 56 : index
    %c0_41 = arith.constant 0 : index
    %95 = vector.load %arg11[%c56, %c0_41] : memref<72x512xf32, #tpu.memory_space<vmem>>, vector<8x512xf32>
    tpu.vector_store %arg11[%c56, %c0_41], %94 {strides = array<i32>} : memref<72x512xf32, #tpu.memory_space<vmem>>, vector<8x512xf32>,
    %c495_i32_42 = arith.constant 495 : i32
    %96 = tpu.dynamic_rotate %56 by %c495_i32_42 dim 1 : vector<8x512xf32>, i32 -> vector<8x512xf32>
    %97 = vector.extract_strided_slice %2 {offsets = [8, 0], sizes = [1, 512], strides = [1, 1]} : vector<9x512xf32> to vector<1x512xf32>
    %98 = vector.broadcast %97 : vector<1x512xf32> to vector<8x512xf32>
    %99 = arith.mulf %96, %98 : vector<8x512xf32>
    %c64 = arith.constant 64 : index
    %c0_43 = arith.constant 0 : index
    %100 = vector.load %arg11[%c64, %c0_43] : memref<72x512xf32, #tpu.memory_space<vmem>>, vector<8x512xf32>
    tpu.vector_store %arg11[%c64, %c0_43], %99 {strides = array<i32>} : memref<72x512xf32, #tpu.memory_space<vmem>>, vector<8x512xf32>,
    %c0_44 = arith.constant 0 : index
    %c0_45 = arith.constant 0 : index
    %101 = vector.load %arg6[%c0_44, %c0_45] : memref<8x72xf32, #tpu.memory_space<vmem>>, vector<8x72xf32>
    %c0_46 = arith.constant 0 : index
    %c0_47 = arith.constant 0 : index
    %102 = vector.load %arg11[%c0_46, %c0_47] : memref<72x512xf32, #tpu.memory_space<vmem>>, vector<72x512xf32>
    %cst_48 = arith.constant dense<0.000000e+00> : vector<8x512xf32>
    %103 = tpu.matmul %101, %102, %cst_48 {dimension_numbers = #tpu.dot_dimension_numbers<[1], [0], [0], [1], [0, 0, 1, 1], [], []>} : vector<8x72xf32>, vector<72x512xf32>, vector<8x512xf32> -> vector<8x512xf32>
    %c0_49 = arith.constant 0 : index
    %c0_50 = arith.constant 0 : index
    %104 = vector.load %arg7[%c0_49, %c0_50] : memref<8x1xf32, #tpu.memory_space<vmem>>, vector<8x1xf32>
    %105 = vector.broadcast %104 : vector<8x1xf32> to vector<8x512xf32>
    %106 = arith.addf %103, %105 : vector<8x512xf32>
    %c0_51 = arith.constant 0 : index
    %c0_52 = arith.constant 0 : index
    %107 = vector.load %arg8[%c0_51, %c0_52] : memref<8x4xf32, #tpu.memory_space<vmem>>, vector<8x4xf32>
    %cst_53 = arith.constant dense<0.000000e+00> : vector<8x512xf32>
    %108 = tpu.matmul %107, %1, %cst_53 {dimension_numbers = #tpu.dot_dimension_numbers<[1], [0], [0], [1], [0, 0, 1, 1], [], []>} : vector<8x4xf32>, vector<4x512xf32>, vector<8x512xf32> -> vector<8x512xf32>
    %c0_54 = arith.constant 0 : index
    %c0_55 = arith.constant 0 : index
    %109 = vector.load %arg9[%c0_54, %c0_55] : memref<8x1xf32, #tpu.memory_space<vmem>>, vector<8x1xf32>
    %110 = vector.broadcast %109 : vector<8x1xf32> to vector<8x512xf32>
    %111 = arith.addf %108, %110 : vector<8x512xf32>
    %112 = vector.extract_strided_slice %2 {offsets = [0, 0], sizes = [1, 512], strides = [1, 1]} : vector<9x512xf32> to vector<1x512xf32>
    %cst_56 = arith.constant 0.000000e+00 : f32
    %113 = vector.broadcast %cst_56 : f32 to vector<1x512xf32>
    %114 = arith.cmpf one, %112, %113 : vector<1x512xf32>
    %c17_i32_57 = arith.constant 17 : i32
    %115 = tpu.dynamic_rotate %106 by %c17_i32_57 dim 1 : vector<8x512xf32>, i32 -> vector<8x512xf32>
    %cst_58 = arith.constant -3.000000e+38 : f32
    %116 = vector.shape_cast %114 : vector<1x512xi1> to vector<1x512xi1>
    %117 = vector.broadcast %116 : vector<1x512xi1> to vector<8x512xi1>
    %118 = vector.broadcast %cst_58 : f32 to vector<8x512xf32>
    %119 = arith.select %117, %115, %118 : vector<8x512xi1>, vector<8x512xf32>
    %120 = vector.extract_strided_slice %2 {offsets = [1, 0], sizes = [1, 512], strides = [1, 1]} : vector<9x512xf32> to vector<1x512xf32>
    %cst_59 = arith.constant 0.000000e+00 : f32
    %121 = vector.broadcast %cst_59 : f32 to vector<1x512xf32>
    %122 = arith.cmpf one, %120, %121 : vector<1x512xf32>
    %c16_i32_60 = arith.constant 16 : i32
    %123 = tpu.dynamic_rotate %106 by %c16_i32_60 dim 1 : vector<8x512xf32>, i32 -> vector<8x512xf32>
    %cst_61 = arith.constant -3.000000e+38 : f32
    %124 = vector.shape_cast %122 : vector<1x512xi1> to vector<1x512xi1>
    %125 = vector.broadcast %124 : vector<1x512xi1> to vector<8x512xi1>
    %126 = vector.broadcast %cst_61 : f32 to vector<8x512xf32>
    %127 = arith.select %125, %123, %126 : vector<8x512xi1>, vector<8x512xf32>
    %128 = arith.maximumf %119, %127 : vector<8x512xf32>
    %129 = vector.extract_strided_slice %2 {offsets = [2, 0], sizes = [1, 512], strides = [1, 1]} : vector<9x512xf32> to vector<1x512xf32>
    %cst_62 = arith.constant 0.000000e+00 : f32
    %130 = vector.broadcast %cst_62 : f32 to vector<1x512xf32>
    %131 = arith.cmpf one, %129, %130 : vector<1x512xf32>
    %c15_i32_63 = arith.constant 15 : i32
    %132 = tpu.dynamic_rotate %106 by %c15_i32_63 dim 1 : vector<8x512xf32>, i32 -> vector<8x512xf32>
    %cst_64 = arith.constant -3.000000e+38 : f32
    %133 = vector.shape_cast %131 : vector<1x512xi1> to vector<1x512xi1>
    %134 = vector.broadcast %133 : vector<1x512xi1> to vector<8x512xi1>
    %135 = vector.broadcast %cst_64 : f32 to vector<8x512xf32>
    %136 = arith.select %134, %132, %135 : vector<8x512xi1>, vector<8x512xf32>
    %137 = arith.maximumf %128, %136 : vector<8x512xf32>
    %138 = vector.extract_strided_slice %2 {offsets = [3, 0], sizes = [1, 512], strides = [1, 1]} : vector<9x512xf32> to vector<1x512xf32>
    %cst_65 = arith.constant 0.000000e+00 : f32
    %139 = vector.broadcast %cst_65 : f32 to vector<1x512xf32>
    %140 = arith.cmpf one, %138, %139 : vector<1x512xf32>
    %c1_i32_66 = arith.constant 1 : i32
    %141 = tpu.dynamic_rotate %106 by %c1_i32_66 dim 1 : vector<8x512xf32>, i32 -> vector<8x512xf32>
    %cst_67 = arith.constant -3.000000e+38 : f32
    %142 = vector.shape_cast %140 : vector<1x512xi1> to vector<1x512xi1>
    %143 = vector.broadcast %142 : vector<1x512xi1> to vector<8x512xi1>
    %144 = vector.broadcast %cst_67 : f32 to vector<8x512xf32>
    %145 = arith.select %143, %141, %144 : vector<8x512xi1>, vector<8x512xf32>
    %146 = arith.maximumf %137, %145 : vector<8x512xf32>
    %147 = vector.extract_strided_slice %2 {offsets = [4, 0], sizes = [1, 512], strides = [1, 1]} : vector<9x512xf32> to vector<1x512xf32>
    %cst_68 = arith.constant 0.000000e+00 : f32
    %148 = vector.broadcast %cst_68 : f32 to vector<1x512xf32>
    %149 = arith.cmpf one, %147, %148 : vector<1x512xf32>
    %cst_69 = arith.constant -3.000000e+38 : f32
    %150 = vector.shape_cast %149 : vector<1x512xi1> to vector<1x512xi1>
    %151 = vector.broadcast %150 : vector<1x512xi1> to vector<8x512xi1>
    %152 = vector.broadcast %cst_69 : f32 to vector<8x512xf32>
    %153 = arith.select %151, %106, %152 : vector<8x512xi1>, vector<8x512xf32>
    %154 = arith.maximumf %146, %153 : vector<8x512xf32>
    %155 = vector.extract_strided_slice %2 {offsets = [5, 0], sizes = [1, 512], strides = [1, 1]} : vector<9x512xf32> to vector<1x512xf32>
    %cst_70 = arith.constant 0.000000e+00 : f32
    %156 = vector.broadcast %cst_70 : f32 to vector<1x512xf32>
    %157 = arith.cmpf one, %155, %156 : vector<1x512xf32>
    %c511_i32_71 = arith.constant 511 : i32
    %158 = tpu.dynamic_rotate %106 by %c511_i32_71 dim 1 : vector<8x512xf32>, i32 -> vector<8x512xf32>
    %cst_72 = arith.constant -3.000000e+38 : f32
    %159 = vector.shape_cast %157 : vector<1x512xi1> to vector<1x512xi1>
    %160 = vector.broadcast %159 : vector<1x512xi1> to vector<8x512xi1>
    %161 = vector.broadcast %cst_72 : f32 to vector<8x512xf32>
    %162 = arith.select %160, %158, %161 : vector<8x512xi1>, vector<8x512xf32>
    %163 = arith.maximumf %154, %162 : vector<8x512xf32>
    %164 = vector.extract_strided_slice %2 {offsets = [6, 0], sizes = [1, 512], strides = [1, 1]} : vector<9x512xf32> to vector<1x512xf32>
    %cst_73 = arith.constant 0.000000e+00 : f32
    %165 = vector.broadcast %cst_73 : f32 to vector<1x512xf32>
    %166 = arith.cmpf one, %164, %165 : vector<1x512xf32>
    %c497_i32_74 = arith.constant 497 : i32
    %167 = tpu.dynamic_rotate %106 by %c497_i32_74 dim 1 : vector<8x512xf32>, i32 -> vector<8x512xf32>
    %cst_75 = arith.constant -3.000000e+38 : f32
    %168 = vector.shape_cast %166 : vector<1x512xi1> to vector<1x512xi1>
    %169 = vector.broadcast %168 : vector<1x512xi1> to vector<8x512xi1>
    %170 = vector.broadcast %cst_75 : f32 to vector<8x512xf32>
    %171 = arith.select %169, %167, %170 : vector<8x512xi1>, vector<8x512xf32>
    %172 = arith.maximumf %163, %171 : vector<8x512xf32>
    %173 = vector.extract_strided_slice %2 {offsets = [7, 0], sizes = [1, 512], strides = [1, 1]} : vector<9x512xf32> to vector<1x512xf32>
    %cst_76 = arith.constant 0.000000e+00 : f32
    %174 = vector.broadcast %cst_76 : f32 to vector<1x512xf32>
    %175 = arith.cmpf one, %173, %174 : vector<1x512xf32>
    %c496_i32_77 = arith.constant 496 : i32
    %176 = tpu.dynamic_rotate %106 by %c496_i32_77 dim 1 : vector<8x512xf32>, i32 -> vector<8x512xf32>
    %cst_78 = arith.constant -3.000000e+38 : f32
    %177 = vector.shape_cast %175 : vector<1x512xi1> to vector<1x512xi1>
    %178 = vector.broadcast %177 : vector<1x512xi1> to vector<8x512xi1>
    %179 = vector.broadcast %cst_78 : f32 to vector<8x512xf32>
    %180 = arith.select %178, %176, %179 : vector<8x512xi1>, vector<8x512xf32>
    %181 = arith.maximumf %172, %180 : vector<8x512xf32>
    %182 = vector.extract_strided_slice %2 {offsets = [8, 0], sizes = [1, 512], strides = [1, 1]} : vector<9x512xf32> to vector<1x512xf32>
    %cst_79 = arith.constant 0.000000e+00 : f32
    %183 = vector.broadcast %cst_79 : f32 to vector<1x512xf32>
    %184 = arith.cmpf one, %182, %183 : vector<1x512xf32>
    %c495_i32_80 = arith.constant 495 : i32
    %185 = tpu.dynamic_rotate %106 by %c495_i32_80 dim 1 : vector<8x512xf32>, i32 -> vector<8x512xf32>
    %cst_81 = arith.constant -3.000000e+38 : f32
    %186 = vector.shape_cast %184 : vector<1x512xi1> to vector<1x512xi1>
    %187 = vector.broadcast %186 : vector<1x512xi1> to vector<8x512xi1>
    %188 = vector.broadcast %cst_81 : f32 to vector<8x512xf32>
    %189 = arith.select %187, %185, %188 : vector<8x512xi1>, vector<8x512xf32>
    %190 = arith.maximumf %181, %189 : vector<8x512xf32>
    %191 = arith.addf %190, %111 : vector<8x512xf32>
    %c0_82 = arith.constant 0 : index
    %c0_83 = arith.constant 0 : index
    %192 = vector.load %arg3[%c0_82, %c0_83] : memref<512x128xf32, #tpu.memory_space<vmem>>, vector<512x128xf32>
    %cst_84 = arith.constant dense<0.000000e+00> : vector<8x128xf32>
    %193 = tpu.matmul %191, %192, %cst_84 {dimension_numbers = #tpu.dot_dimension_numbers<[1], [0], [0], [1], [0, 0, 1, 1], [], []>} : vector<8x512xf32>, vector<512x128xf32>, vector<8x128xf32> -> vector<8x128xf32>
    %c0_85 = arith.constant 0 : index
    %c0_86 = arith.constant 0 : index
    %c0_87 = arith.constant 0 : index
    %194 = vector.load %arg10[%c0_85, %c0_86, %c0_87] : memref<1x8x128xf32, #tpu.memory_space<vmem>>, vector<1x8x128xf32>
    %195 = vector.shape_cast %194 : vector<1x8x128xf32> to vector<8x128xf32>
    %196 = vector.shape_cast %193 : vector<8x128xf32> to vector<1x8x128xf32>
    tpu.vector_store %arg10[%c0_85, %c0_86, %c0_87], %196 {strides = array<i32>} : memref<1x8x128xf32, #tpu.memory_space<vmem>>, vector<1x8x128xf32>,
    return
  }
  func.func @transform_0(%arg0: i32) -> (i32, i32, i32) {
    %c0_i32 = arith.constant 0 : i32
    %c0_i32_0 = arith.constant 0 : i32
    %c0_i32_1 = arith.constant 0 : i32
    return %arg0, %c0_i32, %c0_i32_0 : i32, i32, i32
  }
  func.func @transform_1(%arg0: i32) -> (i32, i32) {
    %c0_i32 = arith.constant 0 : i32
    %c0_i32_0 = arith.constant 0 : i32
    %c0_i32_1 = arith.constant 0 : i32
    return %c0_i32, %c0_i32_0 : i32, i32
  }
  func.func @transform_2(%arg0: i32) -> (i32, i32) {
    %c0_i32 = arith.constant 0 : i32
    %c0_i32_0 = arith.constant 0 : i32
    %c0_i32_1 = arith.constant 0 : i32
    return %c0_i32, %c0_i32_0 : i32, i32
  }
  func.func @transform_3(%arg0: i32) -> (i32, i32) {
    %c0_i32 = arith.constant 0 : i32
    %c0_i32_0 = arith.constant 0 : i32
    %c0_i32_1 = arith.constant 0 : i32
    return %c0_i32, %c0_i32_0 : i32, i32
  }
  func.func @transform_4(%arg0: i32) -> (i32, i32) {
    %c0_i32 = arith.constant 0 : i32
    %c0_i32_0 = arith.constant 0 : i32
    %c0_i32_1 = arith.constant 0 : i32
    return %c0_i32, %c0_i32_0 : i32, i32
  }
  func.func @transform_5(%arg0: i32) -> (i32, i32) {
    %c0_i32 = arith.constant 0 : i32
    %c0_i32_0 = arith.constant 0 : i32
    %c0_i32_1 = arith.constant 0 : i32
    return %c0_i32, %c0_i32_0 : i32, i32
  }
  func.func @transform_6(%arg0: i32) -> (i32, i32) {
    %c0_i32 = arith.constant 0 : i32
    %c0_i32_0 = arith.constant 0 : i32
    %c0_i32_1 = arith.constant 0 : i32
    return %c0_i32, %c0_i32_0 : i32, i32
  }
  func.func @transform_7(%arg0: i32) -> (i32, i32) {
    %c0_i32 = arith.constant 0 : i32
    %c0_i32_0 = arith.constant 0 : i32
    %c0_i32_1 = arith.constant 0 : i32
    return %c0_i32, %c0_i32_0 : i32, i32
  }
  func.func @transform_8(%arg0: i32) -> (i32, i32) {
    %c0_i32 = arith.constant 0 : i32
    %c0_i32_0 = arith.constant 0 : i32
    %c0_i32_1 = arith.constant 0 : i32
    return %c0_i32, %c0_i32_0 : i32, i32
  }
  func.func @transform_9(%arg0: i32) -> (i32, i32, i32) {
    %c0_i32 = arith.constant 0 : i32
    %c0_i32_0 = arith.constant 0 : i32
    %c0_i32_1 = arith.constant 0 : i32
    return %arg0, %c0_i32, %c0_i32_0 : i32, i32, i32
  }
}

</mosaic_0001>

<bundles_post_ra>
// kernel: tpu_custom_call.1
= control target key start
LH: loop header
LB: loop body
LE: loop exit
PB: predicated region body
PF: predicated region fallthrough
CT: control target
= control target key end

     0   :  { %14 = vsyncpa [#allocation4], 0  ;;  %s2662_s0 = inlined_call_operand.vmem [shape: f32[1,4,512], index: 0, kind: input, shape index: {}]   ;;  %s2663_s1 = inlined_call_operand.hbm [shape: f32[9,512], index: 1, kind: input, shape index: {}]   ;;  %s2664_s2 = inlined_call_operand.hbm [shape: f32[512,128], index: 2, kind: input, shape index: {}]   ;;  %s2665_s3 = inlined_call_operand.vmem [shape: f32[8,36], index: 3, kind: input, shape index: {}]   ;;  %s2666_s4 = inlined_call_operand.vmem [shape: f32[8,1], index: 4, kind: input, shape index: {}]   ;;  %s2667_s5 = inlined_call_operand.vmem [shape: f32[8,72], index: 5, kind: input, shape index: {}]   ;;  %s2668_s6 = inlined_call_operand.vmem [shape: f32[8,1], index: 6, kind: input, shape index: {}]   ;;  %s2669_s7 = inlined_call_operand.vmem [shape: f32[8,4], index: 7, kind: input, shape index: {}]   ;;  %s2670_s8 = inlined_call_operand.vmem [shape: f32[8,1], index: 8, kind: input, shape index: {}]   ;;  %s2671_s9 = inlined_call_operand.hbm [shape: f32[1,8,128], index: 9, kind: output, shape index: {}]  }
   0x1   :  { %15 = vsyncpa [#allocation7], 0 }
   0x2   :  { %16 = vsyncpa [#allocation5], 0  ;;  %s23_s11 = sshll.u32 %s2663_s1, 4  ;;  %s1524_s12 = smov [#allocation3]   ;;  %s24_s11 = int_to_ptr.hbm [resolvable:$true] %s23_s11 }
   0x3   :  { %s25_s13 = sshll.u32 %s1524_s12, 4  ;;  %s36_s16 = sshll.u32 %s2664_s2, 4  ;;  %s26_s13 = int_to_ptr.vmem [resolvable:$true] %s25_s13  ;;  %s37_s16 = int_to_ptr.hbm [resolvable:$true] %s36_s16 }
   0x4   :  { %s1525_s17 = smov 512   ;;  %s1526_s18 = smov 32  }
   0x5   :  { %31 = dma.hbm_to_vmem [thread:$0]  %s24_s11, 1024, %s26_s13, [#allocation4], %s1525_s17, %s1525_s17, %s1526_s18  }
   0x6   :  { %s1527_s19 = smov [#allocation6]   ;;  %s1528_s21 = smov 128  }
   0x7   :  { %s38_s20 = sshll.u32 %s1527_s19, 4  ;;  %s1529_s22 = smov 8   ;;  %s39_s20 = int_to_ptr.vmem [resolvable:$true] %s38_s20 }
   0x8   :  { %44 = dma.hbm_to_vmem [thread:$0]  %s37_s16, 8192, %s39_s20, [#allocation7], %s1528_s21, %s1528_s21, %s1529_s22  }
   0x9   :  { %1518 = dma.done.wait [#allocation4], 1024  }
   0xa   :  { %1519 = vsyncadd [#allocation4], 4294966272 }
   0xb   :  { %1520 = dma.done.wait [#allocation7], 8192  }
   0xc   :  { %1521 = vsyncadd [#allocation7], 4294959104  ;;  %v1599_v0 = vld [vmem:[%s2662_s0 + $0x8] sm:$0xff]  ;;  %v1604_v1 = vld [vmem:[%s2662_s0] sm:$0xff]  ;;  %s1530_s25 = smov 17   ;;  %s1531_s0 = smov 16   ;;  %v98_v55 = vlaneseq }
   0xd   :  { %v1607_v2 = vmax.f32 %v1599_v0, 0.0  ;;  %v1610_v3 = vmax.f32 %v1604_v1, 0.0  ;;  %v1621_v8 = vld [vmem:[#allocation3 + $0x18] sm:$0xff]  ;;  %v1623_v9 = vld [vmem:[#allocation3 + $0x8] sm:$0xff]  ;;  %v1634_v16 = vld [vmem:[#allocation3 + $0x10] sm:$0xff]  ;;  %vm259_vm0 = vcmask 1043456  }
   0xe   :  { %v252_v12 = vperm.slane %v1621_v8, 4  ;;  %v250_v15 = vperm.slane %v1623_v9, 4  ;;  %v1636_v17 = vld [vmem:[#allocation3] sm:$0xff]  ;;  %v251_v18 = vperm.slane %v1634_v16, 4  ;;  %s1532_s26 = smov 15   ;;  %s1533_s27 = smov 1  }
   0xf   :  { %81 = vst [vmem:[#allocation1 + $0x10] ss:$2 sm:$0xff] %v1607_v2  ;;  %v249_v20 = vperm.slane %v1636_v17, 4  ;;  %s1534_s28 = smov 127   ;;  %s1535_s29 = smov 113   ;;  %v1697_v56 = vand.u32 127, %v98_v55 }
  0x10   :  { %79 = vst [vmem:[#allocation1] ss:$2 sm:$0xff] %v1610_v3  ;;  %v258_v19 = vrot.slane %v252_v12, 4  ;;  %v257_v21 = vrot.slane %v250_v15, 4  ;;  %s1536_s30 = smov 112   ;;  %s1537_s10 = smov 111  }
  0x11   :  { %v108_v58 = vperm.slane %v1621_v8, 0  ;;  %vm100_vm1 = vcmp.lt.s32.totalorder %v1697_v56, 17  ;;  %v107_v59 = vperm.slane %v1634_v16, 0  ;;  %vm136_vm2 = vcmp.lt.s32.totalorder %v1697_v56, 16  ;;  %s1389_s21 = sshll.u32 %s2671_s9, 4  ;;  %s1390_s21 = int_to_ptr.hbm [resolvable:$true] %s1389_s21 }
  0x12   :  { %v261_v26 = vsel %vm259_vm0, %v251_v18, %v258_v19  ;;  %v260_v27 = vsel %vm259_vm0, %v249_v20, %v257_v21  ;;  %v192_v21 = vperm.slane %v1621_v8, 2  ;;  %vm184_vm3 = vcmp.lt.s32.totalorder %v1697_v56, 15 }
  0x13   :  { %v265_v28 = vmul.f32 %v261_v26, %v1607_v2  ;;  %v264_v29 = vmul.f32 %v260_v27, %v1610_v3  ;;  %vm220_vm4 = vcmp.lt.s32.totalorder %v1697_v56, 1  ;;  %vm302_vm5 = vcmp.lt.s32.totalorder %v1697_v56, 127 }
  0x14   :  { %vm350_vm6 = vcmp.lt.s32.totalorder %v1697_v56, 113  ;;  %v357_v55 = vperm.slane %v1634_v16, 6  ;;  %vm434_vm7 = vcmp.lt.s32.totalorder %v1697_v56, 111  ;;  %vm386_vm8 = vcmp.lt.s32.totalorder %v1697_v56, 112 }
  0x15   :  { %vm478_vm9 = vcmask 293888   ;;  %vm789_vm10 = vcmask 588800   ;;  %vm889_vm11 = vcmask 31744  }
  0x16   :  { %v84_v4 = vld.sshfl [vmem:[#allocation1 + $0x10] sm:$0xff pattern:$0x75316420]  ;;  %v85_v5 = vld.sshfl [vmem:[#allocation1 + $0x18] sm:$0xff pattern:$0x75316420] }
  0x17   :  { %94 = vrot.lane.b32.xlu1 %v84_v4, %s1530_s25  ;;  %119 = vst [vmem:[#allocation1 + $0x10] ss:$2 sm:$0xff] %v1607_v2  ;;  %v83_v6 = vld.sshfl [vmem:[#allocation1 + $0x8] sm:$0xff pattern:$0x75316420]  ;;  %96 = vrot.lane.b32.xlu2 %v85_v5, %s1530_s25  ;;  %v143_v5 = vperm.slane %v1634_v16, 1 }
  0x18   :  { %92 = vrot.lane.b32.xlu0 %v83_v6, %s1530_s25  ;;  %v1618_v7 = vld.sshfl [vmem:[#allocation1] sm:$0xff pattern:$0x75316420] }
  0x19   :  { %117 = vst [vmem:[#allocation1] ss:$2 sm:$0xff] %v1610_v3 }
  0x1e   :  { %v122_v10 = vld.sshfl [vmem:[#allocation1 + $0x10] sm:$0xff pattern:$0x75316420]  ;;  %v123_v11 = vld.sshfl [vmem:[#allocation1 + $0x18] sm:$0xff pattern:$0x75316420] }
  0x1f   :  { %132 = vrot.lane.b32.xlu1 %v122_v10, %s1531_s0  ;;  %167 = vst [vmem:[#allocation1 + $0x10] ss:$2 sm:$0xff] %v1607_v2  ;;  %134 = vrot.lane.b32.xlu2 %v123_v11, %s1531_s0 }
  0x20   :  { %v121_v13 = vld.sshfl [vmem:[#allocation1 + $0x8] sm:$0xff pattern:$0x75316420]  ;;  %v1629_v14 = vld.sshfl [vmem:[#allocation1] sm:$0xff pattern:$0x75316420] }
  0x21   :  { %130 = vrot.lane.b32.xlu0 %v121_v13, %s1531_s0  ;;  %165 = vst [vmem:[#allocation1] ss:$2 sm:$0xff] %v1610_v3 }
  0x26   :  { %v170_v22 = vld.sshfl [vmem:[#allocation1 + $0x10] sm:$0xff pattern:$0x75316420]  ;;  %v171_v23 = vld.sshfl [vmem:[#allocation1 + $0x18] sm:$0xff pattern:$0x75316420] }
  0x27   :  { %180 = vrot.lane.b32.xlu1 %v170_v22, %s1532_s26  ;;  %203 = vst [vmem:[#allocation1 + $0x10] ss:$2 sm:$0xff] %v1607_v2  ;;  %182 = vrot.lane.b32.xlu2 %v171_v23, %s1532_s26 }
  0x28   :  { %v169_v24 = vld.sshfl [vmem:[#allocation1 + $0x8] sm:$0xff pattern:$0x75316420]  ;;  %v1647_v25 = vld.sshfl [vmem:[#allocation1] sm:$0xff pattern:$0x75316420] }
  0x29   :  { %178 = vrot.lane.b32.xlu0 %v169_v24, %s1532_s26  ;;  %201 = vst [vmem:[#allocation1] ss:$2 sm:$0xff] %v1610_v3  ;;  %v191_v24 = vperm.slane %v1634_v16, 2 }
  0x2e   :  { %v206_v30 = vld.sshfl [vmem:[#allocation1 + $0x10] sm:$0xff pattern:$0x75316420]  ;;  %v207_v31 = vld.sshfl [vmem:[#allocation1 + $0x18] sm:$0xff pattern:$0x75316420] }
  0x2f   :  { %216 = vrot.lane.b32.xlu1 %v206_v30, %s1533_s27  ;;  %218 = vrot.lane.b32.xlu2 %v207_v31, %s1533_s27  ;;  %270 = vst [vmem:[#allocation1 + $0x10] ss:$2 sm:$0xff] %v265_v28  ;;  %v228_v30 = vperm.slane %v1621_v8, 3 }
  0x30   :  { %v204_v32 = vld.sshfl [vmem:[#allocation1] sm:$0xff pattern:$0x75316420]  ;;  %v205_v33 = vld.sshfl [vmem:[#allocation1 + $0x8] sm:$0xff pattern:$0x75316420] }
  0x31   :  { %214 = vrot.lane.b32.xlu0 %v205_v33, %s1533_s27  ;;  %268 = vst [vmem:[#allocation1] ss:$2 sm:$0xff] %v264_v29 }
  0x36   :  { %v273_v34 = vld.sshfl [vmem:[#allocation1 + $0x10] sm:$0xff pattern:$0x75316420]  ;;  %v274_v37 = vld.sshfl [vmem:[#allocation1 + $0x18] sm:$0xff pattern:$0x75316420] }
  0x37   :  { %281 = vst [vmem:[#allocation2 + $0x118] sm:$0xf] %v273_v34 }
  0x38   :  { %v271_v35 = vld.sshfl [vmem:[#allocation1] sm:$0xff pattern:$0x75316420]  ;;  %v272_v36 = vld.sshfl [vmem:[#allocation1 + $0x8] sm:$0xff pattern:$0x75316420] }
  0x39   :  { %279 = vst [vmem:[#allocation2 + $0x80] sm:$0xf] %v271_v35 }
  0x3a   :  { %280 = vst [vmem:[#allocation2 + $0x110] sm:$0xf] %v272_v36 }
  0x3b   :  { %283 = vst [vmem:[#allocation1] ss:$2 sm:$0xff] %v1610_v3 }
  0x3c   :  { %282 = vst [vmem:[#allocation2 + $0x98] sm:$0xf] %v274_v37 }
  0x3d   :  { %285 = vst [vmem:[#allocation1 + $0x10] ss:$2 sm:$0xff] %v1607_v2 }
  0x42   :  { %v286_v38 = vld.sshfl [vmem:[#allocation1] sm:$0xff pattern:$0x75316420]  ;;  %v287_v39 = vld.sshfl [vmem:[#allocation1 + $0x8] sm:$0xff pattern:$0x75316420] }
  0x43   :  { %294 = vrot.lane.b32.xlu0 %v286_v38, %s1534_s28  ;;  %331 = vst [vmem:[#allocation1] ss:$2 sm:$0xff] %v1610_v3 }
  0x44   :  { %v288_v40 = vld.sshfl [vmem:[#allocation1 + $0x10] sm:$0xff pattern:$0x75316420]  ;;  %v289_v41 = vld.sshfl [vmem:[#allocation1 + $0x18] sm:$0xff pattern:$0x75316420] }
  0x45   :  { %298 = vrot.lane.b32.xlu1 %v288_v40, %s1534_s28  ;;  %300 = vrot.lane.b32.xlu2 %v289_v41, %s1534_s28  ;;  %333 = vst [vmem:[#allocation1 + $0x10] ss:$2 sm:$0xff] %v1607_v2 }
  0x4a   :  { %v334_v42 = vld.sshfl [vmem:[#allocation1] sm:$0xff pattern:$0x75316420]  ;;  %v335_v43 = vld.sshfl [vmem:[#allocation1 + $0x8] sm:$0xff pattern:$0x75316420] }
  0x4b   :  { %342 = vrot.lane.b32.xlu0 %v334_v42, %s1535_s29  ;;  %367 = vst [vmem:[#allocation1] ss:$2 sm:$0xff] %v1610_v3  ;;  %v310_v42 = vperm.slane %v1621_v8, 5 }
  0x4c   :  { %v336_v44 = vld.sshfl [vmem:[#allocation1 + $0x10] sm:$0xff pattern:$0x75316420]  ;;  %v337_v45 = vld.sshfl [vmem:[#allocation1 + $0x18] sm:$0xff pattern:$0x75316420] }
  0x4d   :  { %346 = vrot.lane.b32.xlu1 %v336_v44, %s1535_s29  ;;  %348 = vrot.lane.b32.xlu2 %v337_v45, %s1535_s29  ;;  %369 = vst [vmem:[#allocation1 + $0x10] ss:$2 sm:$0xff] %v1607_v2 }
  0x52   :  { %v371_v46 = vld.sshfl [vmem:[#allocation1 + $0x8] sm:$0xff pattern:$0x75316420]  ;;  %v370_v47 = vld.sshfl [vmem:[#allocation1] sm:$0xff pattern:$0x75316420] }
  0x53   :  { %378 = vrot.lane.b32.xlu0 %v370_v47, %s1536_s30  ;;  %415 = vst [vmem:[#allocation1] ss:$2 sm:$0xff] %v1610_v3 }
  0x54   :  { %v372_v48 = vld.sshfl [vmem:[#allocation1 + $0x10] sm:$0xff pattern:$0x75316420]  ;;  %v373_v49 = vld.sshfl [vmem:[#allocation1 + $0x18] sm:$0xff pattern:$0x75316420] }
  0x55   :  { %384 = vrot.lane.b32.xlu1 %v373_v49, %s1536_s30  ;;  %417 = vst [vmem:[#allocation1 + $0x10] ss:$2 sm:$0xff] %v1607_v2  ;;  %v144_v2 = vperm.slane %v1621_v8, 1 }
  0x5a   :  { %v418_v50 = vld.sshfl [vmem:[#allocation1] sm:$0xff pattern:$0x75316420]  ;;  %v419_v51 = vld.sshfl [vmem:[#allocation1 + $0x8] sm:$0xff pattern:$0x75316420] }
  0x5b   :  { %382 = vrot.lane.b32.xlu0 %v372_v48, %s1536_s30  ;;  %882 = vst [vmem:[#allocation1] ss:$2 sm:$0xff] %v1604_v1 }
  0x5c   :  { %v420_v52 = vld.sshfl [vmem:[#allocation1 + $0x10] sm:$0xff pattern:$0x75316420]  ;;  %v421_v53 = vld.sshfl [vmem:[#allocation1 + $0x18] sm:$0xff pattern:$0x75316420] }
  0x5d   :  { %430 = vrot.lane.b32.xlu2 %v420_v52, %s1537_s10  ;;  %426 = vrot.lane.b32.xlu1 %v418_v50, %s1537_s10  ;;  %884 = vst [vmem:[#allocation1 + $0x10] ss:$2 sm:$0xff] %v1599_v0 }
  0x63   :  { %380 = vrot.lane.b32.xlu0 %v371_v46, %s1536_s30 }
  0x65   :  { %432 = vrot.lane.b32.xlu2 %v421_v53, %s1537_s10  ;;  %212 = vrot.lane.b32.xlu1 %v204_v32, %s1533_s27  ;;  %v227_v32 = vperm.slane %v1634_v16, 3  ;;  %v358_v53 = vperm.slane %v1621_v8, 6 }
  0x6b   :  { %344 = vrot.lane.b32.xlu0 %v335_v43, %s1535_s29  ;;  %v309_v43 = vperm.slane %v1634_v16, 5 }
  0x6d   :  { %296 = vrot.lane.b32.xlu2 %v287_v39, %s1534_s28  ;;  %428 = vrot.lane.b32.xlu1 %v419_v51, %s1537_s10 }
  0x71   :  { %v1695_v54 = vpop.permute.xlu2 %96 }
  0x73   :  { %176 = vrot.lane.b32.xlu0 %v1647_v25, %s1532_s26 }
  0x75   :  { %128 = vrot.lane.b32.xlu2 %v1629_v14, %s1531_s0  ;;  %90 = vrot.lane.b32.xlu1 %v1618_v7, %s1530_s25 }
  0x79   :  { %v1699_v57 = vpop.permute.xlu2 %134 }
  0x81   :  { %v1718_v3 = vpop.permute.xlu2 %182 }
  0x89   :  { %v95_v60 = vpop.permute.xlu1 %94  ;;  %v1735_v23 = vpop.permute.xlu2 %218 }
  0x8a   :  { %v101_v61 = vsel %vm100_vm1, %v95_v60, %v1695_v54  ;;  %v1707_v62 = vpop.permute.xlu0 %92 }
  0x8b   :  { %v112_v63 = vmul.f32 %v108_v58, %v101_v61  ;;  %v102_v0 = vsel %vm100_vm1, %v1707_v62, %v95_v60  ;;  %v1782_v60 = vld [vmem:[#allocation3 + $0x30] ss:$0 sm:$0xff] }
  0x8c   :  { %v111_v1 = vmul.f32 %v107_v59, %v102_v0 }
  0x8d   :  { %116 = vst [vmem:[#allocation2 + $0x48] sm:$0xf] %v112_v63 }
  0x8e   :  { %115 = vst [vmem:[#allocation2 + $0x10] sm:$0xf] %v111_v1 }
  0x91   :  { %v133_v4 = vpop.permute.xlu1 %132 }
  0x92   :  { %v137_v6 = vsel %vm136_vm2, %v133_v4, %v1699_v57 }
  0x93   :  { %v148_v7 = vmul.f32 %v144_v2, %v137_v6  ;;  %v1726_v10 = vpop.permute.xlu0 %130 }
  0x94   :  { %v138_v11 = vsel %vm136_vm2, %v1726_v10, %v133_v4 }
  0x95   :  { %v156_v13 = vrot.slane %v148_v7, 4  ;;  %v147_v14 = vmul.f32 %v143_v5, %v138_v11 }
  0x97   :  { %164 = vst [vmem:[#allocation2 + $0x48] sm:$0xf0] %v156_v13  ;;  %v155_v19 = vrot.slane %v147_v14, 4  ;;  %v307_v14 = vperm.slane %v1636_v17, 5 }
  0x99   :  { %163 = vst [vmem:[#allocation2 + $0x10] sm:$0xf0] %v155_v19  ;;  %v181_v22 = vpop.permute.xlu1 %180  ;;  %v308_v19 = vperm.slane %v1623_v9, 5 }
  0x9a   :  { %v185_v25 = vsel %vm184_vm3, %v181_v22, %v1718_v3 }
  0x9b   :  { %v196_v26 = vmul.f32 %v192_v21, %v185_v25  ;;  %v1743_v27 = vpop.permute.xlu0 %178 }
  0x9c   :  { %v186_v28 = vsel %vm184_vm3, %v1743_v27, %v181_v22  ;;  %v394_v22 = vperm.slane %v1621_v8, 7 }
  0x9d   :  { %200 = vst [vmem:[#allocation2 + $0x18] sm:$0xf] %v196_v26  ;;  %v195_v29 = vmul.f32 %v191_v24, %v186_v28 }
  0x9f   :  { %199 = vst [vmem:[#allocation2 + $0x30] sm:$0xf] %v195_v29  ;;  %v301_v35 = vpop.permute.xlu2 %300 }
  0xa1   :  { %v217_v31 = vpop.permute.xlu1 %216 }
  0xa2   :  { %v221_v33 = vsel %vm220_vm4, %v217_v31, %v1735_v23 }
  0xa3   :  { %v232_v34 = vmul.f32 %v228_v30, %v221_v33  ;;  %v1758_v36 = vpop.permute.xlu0 %214 }
  0xa4   :  { %v222_v37 = vsel %vm220_vm4, %v1758_v36, %v217_v31 }
  0xa5   :  { %v240_v38 = vrot.slane %v232_v34, 4  ;;  %v231_v39 = vmul.f32 %v227_v32, %v222_v37 }
  0xa7   :  { %248 = vst [vmem:[#allocation2 + $0x18] sm:$0xf0] %v240_v38  ;;  %v239_v40 = vrot.slane %v231_v39, 4  ;;  %v349_v41 = vpop.permute.xlu2 %348 }
  0xa9   :  { %247 = vst [vmem:[#allocation2 + $0x30] sm:$0xf0] %v239_v40 }
  0xb5   :  { %v295_v44 = vpop.permute.xlu0 %294 }
  0xb6   :  { %v306_v45 = vsel %vm302_vm5, %v301_v35, %v295_v44 }
  0xb7   :  { %v299_v46 = vpop.permute.xlu1 %298  ;;  %v1770_v47 = vpop.permute.xlu2 %430  ;;  %v314_v48 = vmul.f32 %v310_v42, %v306_v45 }
  0xb8   :  { %v303_v49 = vsel %vm302_vm5, %v299_v46, %v301_v35 }
  0xb9   :  { %v313_v50 = vmul.f32 %v309_v43, %v303_v49  ;;  %v322_v51 = vrot.slane %v314_v48, 4  ;;  %v1822_v49 = vld [vmem:[#allocation3 + $0x38] ss:$0 sm:$0xff] }
  0xbb   :  { %v321_v52 = vrot.slane %v313_v50, 4  ;;  %330 = vst [vmem:[#allocation2 + $0x98] sm:$0xf0] %v322_v51 }
  0xbd   :  { %329 = vst [vmem:[#allocation2 + $0x118] sm:$0xf0] %v321_v52  ;;  %v1784_v61 = vpop.permute.xlu0 %342 }
  0xbe   :  { %v354_v63 = vsel %vm350_vm6, %v349_v41, %v1784_v61 }
  0xbf   :  { %v1789_v0 = vpop.permute.xlu1 %346  ;;  %v433_v1 = vpop.permute.xlu2 %432  ;;  %v362_v4 = vmul.f32 %v358_v53, %v354_v63 }
  0xc0   :  { %v351_v6 = vsel %vm350_vm6, %v1789_v0, %v349_v41  ;;  %v435_v7 = vsel %vm434_vm7, %v1770_v47, %v433_v1  ;;  %v393_v41 = vperm.slane %v1634_v16, 7 }
  0xc1   :  { %v361_v11 = vmul.f32 %v357_v55, %v351_v6  ;;  %v445_v13 = vmul.f32 %v1782_v60, %v435_v7  ;;  %366 = vst [vmem:[#allocation2 + $0x78] sm:$0xf] %v362_v4 }
  0xc3   :  { %365 = vst [vmem:[#allocation2 + $0x8] sm:$0xf] %v361_v11 }
  0xc4   :  { %449 = vst [vmem:[#allocation2 + $0x90] sm:$0xf] %v445_v13 }
  0xc5   :  { %v379_v25 = vpop.permute.xlu0 %378 }
  0xc7   :  { %v385_v26 = vpop.permute.xlu1 %384  ;;  %v297_v28 = vpop.permute.xlu2 %296 }
  0xc8   :  { %v304_v29 = vsel %vm302_vm5, %v297_v28, %v299_v46  ;;  %v305_v31 = vsel %vm302_vm5, %v295_v44, %v297_v28  ;;  %v390_v33 = vsel %vm386_vm8, %v385_v26, %v379_v25  ;;  %v141_v44 = vperm.slane %v1636_v17, 1 }
  0xc9   :  { %v311_v34 = vmul.f32 %v307_v14, %v305_v31  ;;  %v312_v35 = vmul.f32 %v308_v19, %v304_v29  ;;  %v398_v37 = vmul.f32 %v394_v22, %v390_v33  ;;  %v142_v46 = vperm.slane %v1623_v9, 1 }
  0xcb   :  { %v319_v38 = vrot.slane %v311_v34, 4  ;;  %v320_v39 = vrot.slane %v312_v35, 4  ;;  %v406_v40 = vrot.slane %v398_v37, 4  ;;  %v470_v45 = vld [vmem:[#allocation2 + $0x90] sm:$0xf]  ;;  %v226_v34 = vperm.slane %v1623_v9, 3 }
  0xcc   :  { %1404 = vmatpush.msk.msra.mxu2 %vm259_vm0, %v470_v45  ;;  %v472_v35 = vld [vmem:[%s2666_s4] sm:$0xff] }
  0xcd   :  { %327 = vst [vmem:[#allocation2 + $0x80] sm:$0xf0] %v319_v38  ;;  %v383_v48 = vpop.permute.xlu0 %382 }
  0xce   :  { %328 = vst [vmem:[#allocation2 + $0x110] sm:$0xf0] %v320_v39  ;;  %v387_v50 = vsel %vm386_vm8, %v383_v48, %v385_v26  ;;  %v2672_v39 = vmov 0  }
  0xcf   :  { %414 = vst [vmem:[#allocation2 + $0x78] sm:$0xf0] %v406_v40  ;;  %v129_v51 = vpop.permute.xlu2 %128  ;;  %v397_v52 = vmul.f32 %v393_v41, %v387_v50  ;;  %v1828_v63 = vpop.permute.xlu1 %426  ;;  %1436 = vset.pattern.permute.xlu2 %v2672_v39  ;;  %1437 = vset.pattern.permute.xlu0 %v2672_v39 }
  0xd0   :  { %v139_v4 = vsel %vm136_vm2, %v129_v51, %v1726_v10  ;;  %v140_v6 = vsel %vm136_vm2, %v1699_v57, %v129_v51  ;;  %v438_v7 = vsel %vm434_vm7, %v433_v1, %v1828_v63  ;;  %v391_v10 = vperm.slane %v1636_v17, 7  ;;  %475 = vperm.xlu2 %1436, %v472_v35   ;;  %v1876_v35 = vld [vmem:[#allocation3 + $0x28] ss:$0 sm:$0xff] }
  0xd1   :  { %v145_v11 = vmul.f32 %v141_v44, %v140_v6  ;;  %v146_v13 = vmul.f32 %v142_v46, %v139_v4  ;;  %v405_v26 = vrot.slane %v397_v52, 4  ;;  %v446_v28 = vmul.f32 %v1822_v49, %v438_v7 }
  0xd2   :  { %v392_v57 = vperm.slane %v1623_v9, 7  ;;  %v225_v1 = vperm.slane %v1636_v17, 3 }
  0xd3   :  { %v153_v29 = vrot.slane %v145_v11, 4  ;;  %v154_v31 = vrot.slane %v146_v13, 4  ;;  %413 = vst [vmem:[#allocation2 + $0x8] sm:$0xf0] %v405_v26  ;;  %v355_v11 = vperm.slane %v1636_v17, 6  ;;  %v356_v13 = vperm.slane %v1623_v9, 6 }
  0xd4   :  { %450 = vst [vmem:[#allocation2 + $0xa0] sm:$0xf] %v446_v28 }
  0xd5   :  { %161 = vst [vmem:[#allocation2 + $0xb0] sm:$0xf0] %v153_v29  ;;  %v381_v33 = vpop.permute.xlu0 %380  ;;  %v1874_v29 = vld [vmem:[#allocation3 + $0x20] ss:$0 sm:$0xff] }
  0xd6   :  { %162 = vst [vmem:[#allocation2 + $0xd0] sm:$0xf0] %v154_v31  ;;  %v388_v37 = vsel %vm386_vm8, %v381_v33, %v383_v48  ;;  %v389_v38 = vsel %vm386_vm8, %v379_v25, %v381_v33  ;;  %v467_v31 = vld [vmem:[#allocation2 + $0x78] sm:$0xff] }
  0xd7   :  { %v395_v40 = vmul.f32 %v391_v10, %v389_v38  ;;  %v396_v45 = vmul.f32 %v392_v57, %v388_v37  ;;  %v213_v50 = vpop.permute.xlu1 %212 }
  0xd8   :  { %v223_v48 = vsel %vm220_vm4, %v213_v50, %v1758_v36  ;;  %v224_v25 = vsel %vm220_vm4, %v1735_v23, %v213_v50  ;;  %v462_v23 = vld [vmem:[#allocation2 + $0x118] sm:$0xff] }
  0xd9   :  { %v403_v51 = vrot.slane %v395_v40, 4  ;;  %v404_v52 = vrot.slane %v396_v45, 4  ;;  %v229_v4 = vmul.f32 %v225_v1, %v224_v25  ;;  %v230_v6 = vmul.f32 %v226_v34, %v223_v48  ;;  %v458_v40 = vld [vmem:[#allocation2 + $0x30] sm:$0xff]  ;;  %v463_v48 = vld [vmem:[#allocation2 + $0x98] sm:$0xff] }
  0xda   :  { %v466_v7 = vld [vmem:[#allocation2 + $0x8] sm:$0xff] }
  0xdb   :  { %411 = vst [vmem:[#allocation2 + $0xf8] sm:$0xf0] %v403_v51  ;;  %v237_v26 = vrot.slane %v229_v4, 4  ;;  %v238_v36 = vrot.slane %v230_v6, 4  ;;  %v471_v28 = vld [vmem:[#allocation2 + $0xa0] sm:$0xf]  ;;  %546 = vmatpush.msra.mxu2 %v466_v7 }
  0xdc   :  { %412 = vst [vmem:[#allocation2 + $0x38] sm:$0xf0] %v404_v52  ;;  %1406 = vmatpush.msk.msra.mxu3 %vm259_vm0, %v471_v28  ;;  %v451_v51 = vld [vmem:[%s2665_s3] sm:$0xff]  ;;  %v454_v52 = vld [vmem:[#allocation2 + $0x10] sm:$0xff]  ;;  %v105_v28 = vperm.slane %v1636_v17, 0 }
  0xdd   :  { %245 = vst [vmem:[#allocation2 + $0x108] sm:$0xf0] %v237_v26  ;;  %547 = vmatpush.msra.mxu2 %v462_v23  ;;  %v345_v33 = vpop.permute.xlu0 %344  ;;  %v459_v7 = vld [vmem:[#allocation2 + $0x18] sm:$0xff]  ;;  %v455_v26 = vld [vmem:[#allocation2 + $0x48] sm:$0xff]  ;;  %v2674_v23 = vperm.slane %v1623_v9, 0 }
  0xde   :  { %246 = vst [vmem:[#allocation2 + $0x68] sm:$0xf0] %v238_v36  ;;  %566 = vmatpush.msra.mxu3 %v467_v31  ;;  %v352_v37 = vsel %vm350_vm6, %v345_v33, %v1789_v0  ;;  %v353_v38 = vsel %vm350_vm6, %v1784_v61, %v345_v33  ;;  %v190_v36 = vperm.slane %v1623_v9, 2 }
  0xdf   :  { %v359_v45 = vmul.f32 %v355_v11, %v353_v38  ;;  %v360_v50 = vmul.f32 %v356_v13, %v352_v37  ;;  %v429_v25 = vpop.permute.xlu1 %428  ;;  %548 = vmatpush.msra.mxu2 %v458_v40 }
  0xe0   :  { %567 = vmatpush.msra.mxu3 %v463_v48  ;;  %v436_v61 = vsel %vm434_vm7, %v429_v25, %v1770_v47  ;;  %v437_v0 = vsel %vm434_vm7, %v1828_v63, %v429_v25  ;;  %v189_v47 = vperm.slane %v1636_v17, 2  ;;  %v873_v17 = vld [vmem:[%s2669_s7] sm:$0xff]  ;;  %s1539_s7 = smov [#allocation8]  }
  0xe1   :  { %363 = vst [vmem:[#allocation2 + $0xf8] sm:$0xf] %v359_v45  ;;  %v443_v4 = vmul.f32 %v1874_v29, %v437_v0  ;;  %v444_v6 = vmul.f32 %v1876_v35, %v436_v61  ;;  %549 = vmatpush.msra.mxu2 %v454_v52  ;;  %v461_v0 = vld [vmem:[#allocation2 + $0x110] sm:$0xff]  ;;  %s1387_s18 = sshll.u32 %s1539_s7, 4  ;;  %s1388_s18 = int_to_ptr.vmem [resolvable:$true] %s1387_s18 }
  0xe2   :  { %364 = vst [vmem:[#allocation2 + $0x38] sm:$0xf] %v360_v50  ;;  %568 = vmatpush.msra.mxu3 %v459_v7  ;;  %1405 = vmatmul.msk.f32.vlgmr.msra.gmra.mxu2 %vm478_vm9, %v451_v51 }
  0xe3   :  { %447 = vst [vmem:[#allocation2 + $0x20] sm:$0xf] %v443_v4 }
  0xe4   :  { %448 = vst [vmem:[#allocation2 + $0xc8] sm:$0xf] %v444_v6  ;;  %569 = vmatpush.msra.mxu3 %v455_v26 }
  0xe5   :  { %v177_v63 = vpop.permute.xlu0 %176  ;;  %1407 = vmatmul.msk.f32.vlgmr.msra.gmra.mxu3 %vm478_vm9, %v451_v51 }
  0xe6   :  { %v187_v31 = vsel %vm184_vm3, %v177_v63, %v1743_v27  ;;  %v188_v33 = vsel %vm184_vm3, %v1718_v3, %v177_v63 }
  0xe7   :  { %v193_v37 = vmul.f32 %v189_v47, %v188_v33  ;;  %v194_v38 = vmul.f32 %v190_v36, %v187_v31  ;;  %v91_v40 = vpop.permute.xlu1 %90 }
  0xe8   :  { %v103_v45 = vsel %vm100_vm1, %v91_v40, %v1707_v62  ;;  %v104_v50 = vsel %vm100_vm1, %v1695_v54, %v91_v40  ;;  %v464_v62 = vld [vmem:[#allocation2 + $0xf8] sm:$0xff]  ;;  %v460_v54 = vld [vmem:[#allocation2 + $0x80] sm:$0xff] }
  0xe9   :  { %197 = vst [vmem:[#allocation2 + $0x108] sm:$0xf] %v193_v37  ;;  %v109_v27 = vmul.f32 %v105_v28, %v104_v50  ;;  %v110_v3 = vmul.f32 %v2674_v23, %v103_v45  ;;  %v465_v61 = vld [vmem:[#allocation2 + $0x38] sm:$0xff] }
  0xea   :  { %198 = vst [vmem:[#allocation2 + $0x68] sm:$0xf] %v194_v38  ;;  %v468_v48 = vld [vmem:[#allocation2 + $0x20] sm:$0xf] }
  0xeb   :  { %113 = vst [vmem:[#allocation2 + $0xb0] sm:$0xf] %v109_v27  ;;  %1400 = vmatpush.msk.msra.mxu0 %vm259_vm0, %v468_v48  ;;  %v469_v25 = vld [vmem:[#allocation2 + $0xc8] sm:$0xf] }
  0xec   :  { %114 = vst [vmem:[#allocation2 + $0xd0] sm:$0xf] %v110_v3  ;;  %1402 = vmatpush.msk.msra.mxu1 %vm259_vm0, %v469_v25 }
  0xed   :  { %506 = vmatpush.msra.mxu0 %v464_v62 }
  0xee   :  { %526 = vmatpush.msra.mxu1 %v465_v61 }
  0xef   :  { %507 = vmatpush.msra.mxu0 %v460_v54 }
  0xf0   :  { %527 = vmatpush.msra.mxu1 %v461_v0  ;;  %v456_v52 = vld [vmem:[#allocation2 + $0x108] sm:$0xff] }
  0xf1   :  { %508 = vmatpush.msra.mxu0 %v456_v52  ;;  %v457_v4 = vld [vmem:[#allocation2 + $0x68] sm:$0xff] }
  0xf2   :  { %528 = vmatpush.msra.mxu1 %v457_v4  ;;  %v452_v6 = vld [vmem:[#allocation2 + $0xb0] sm:$0xff] }
  0xf3   :  { %509 = vmatpush.msra.mxu0 %v452_v6  ;;  %v453_v7 = vld [vmem:[#allocation2 + $0xd0] sm:$0xff] }
  0xf4   :  { %529 = vmatpush.msra.mxu1 %v453_v7  ;;  %1401 = vmatmul.msk.f32.vlgmr.msra.gmra.mxu0 %vm478_vm9, %v451_v51 }
  0xf5   :  { %1403 = vmatmul.msk.f32.vlgmr.msra.gmra.mxu1 %vm478_vm9, %v451_v51 }
 0x12a   :  { %v476_v26 = vpop.permute.xlu2 %475 }
 0x165   :  { %v551_v63 = vpop.f32.mrf.mxu2 }
 0x166   :  { %v552_v31 = vadd.f32 %v551_v63, %v476_v26 }
 0x168   :  { %v576_v33 = vmax.f32 %v552_v31, 0.0  ;;  %v571_v37 = vpop.f32.mrf.mxu3 }
 0x169   :  { %v572_v38 = vadd.f32 %v571_v37, %v476_v26 }
 0x16a   :  { %v1931_v40 = vmul.f32 %v576_v33, %v251_v18 }
 0x16b   :  { %v577_v45 = vmax.f32 %v572_v38, 0.0 }
 0x16c   :  { %664 = vst [vmem:[#allocation2 + $0x90] sm:$0xff] %v1931_v40 }
 0x16d   :  { %v1936_v50 = vmul.f32 %v577_v45, %v252_v12 }
 0x16f   :  { %665 = vst [vmem:[#allocation2 + $0xa0] sm:$0xff] %v1936_v50 }
 0x171   :  { %v511_v51 = vpop.f32.mrf.mxu0 }
 0x172   :  { %v512_v27 = vadd.f32 %v511_v51, %v476_v26  ;;  %v531_v3 = vpop.f32.mrf.mxu1 }
 0x173   :  { %v532_v48 = vadd.f32 %v531_v3, %v476_v26 }
 0x174   :  { %v574_v25 = vmax.f32 %v512_v27, 0.0 }
 0x175   :  { %v575_v62 = vmax.f32 %v532_v48, 0.0 }
 0x176   :  { %666 = vrot.lane.b32.xlu0 %v574_v25, %s1534_s28  ;;  %726 = vrot.lane.b32.xlu1 %v574_v25, %s1537_s10  ;;  %v1943_v18 = vmul.f32 %v574_v25, %v249_v20  ;;  %v874_v20 = vld [vmem:[%s2670_s8] sm:$0xff] }
 0x177   :  { %728 = vrot.lane.b32.xlu2 %v575_v62, %s1537_s10  ;;  %v1948_v12 = vmul.f32 %v575_v62, %v250_v15  ;;  %v783_v15 = vld [vmem:[%s2668_s6] sm:$0xff] }
 0x178   :  { %662 = vst [vmem:[#allocation2 + $0x20] sm:$0xff] %v1943_v18 }
 0x179   :  { %663 = vst [vmem:[#allocation2 + $0xc8] sm:$0xff] %v1948_v12 }
 0x17e   :  { %600 = vrot.lane.b32.xlu0 %v575_v62, %s1531_s0  ;;  %706 = vrot.lane.b32.xlu1 %v574_v25, %s1536_s30 }
 0x17f   :  { %640 = vrot.lane.b32.xlu2 %v575_v62, %s1533_s27 }
 0x186   :  { %580 = vrot.lane.b32.xlu0 %v575_v62, %s1530_s25  ;;  %686 = vrot.lane.b32.xlu1 %v574_v25, %s1535_s29 }
 0x187   :  { %620 = vrot.lane.b32.xlu2 %v575_v62, %s1532_s26 }
 0x18e   :  { %638 = vrot.lane.b32.xlu0 %v574_v25, %s1533_s27  ;;  %708 = vrot.lane.b32.xlu1 %v575_v62, %s1536_s30 }
 0x18f   :  { %668 = vrot.lane.b32.xlu2 %v575_v62, %s1534_s28 }
 0x196   :  { %730 = vrot.lane.b32.xlu0 %v576_v33, %s1537_s10  ;;  %688 = vrot.lane.b32.xlu1 %v575_v62, %s1535_s29 }
 0x197   :  { %710 = vrot.lane.b32.xlu2 %v576_v33, %s1536_s30 }
 0x19e   :  { %712 = vrot.lane.b32.xlu0 %v577_v45, %s1536_s30  ;;  %732 = vrot.lane.b32.xlu1 %v577_v45, %s1537_s10 }
 0x19f   :  { %690 = vrot.lane.b32.xlu2 %v576_v33, %s1535_s29 }
 0x1a6   :  { %692 = vrot.lane.b32.xlu0 %v577_v45, %s1535_s29  ;;  %644 = vrot.lane.b32.xlu1 %v577_v45, %s1533_s27 }
 0x1a7   :  { %670 = vrot.lane.b32.xlu2 %v576_v33, %s1534_s28 }
 0x1ae   :  { %672 = vrot.lane.b32.xlu0 %v577_v45, %s1534_s28  ;;  %602 = vrot.lane.b32.xlu1 %v576_v33, %s1531_s0 }
 0x1af   :  { %624 = vrot.lane.b32.xlu2 %v577_v45, %s1532_s26 }
 0x1b6   :  { %642 = vrot.lane.b32.xlu0 %v576_v33, %s1533_s27  ;;  %582 = vrot.lane.b32.xlu1 %v576_v33, %s1530_s25 }
 0x1b7   :  { %604 = vrot.lane.b32.xlu2 %v577_v45, %s1531_s0 }
 0x1be   :  { %622 = vrot.lane.b32.xlu0 %v576_v33, %s1532_s26  ;;  %584 = vrot.lane.b32.xlu1 %v577_v45, %s1530_s25 }
 0x1bf   :  { %618 = vrot.lane.b32.xlu2 %v574_v25, %s1532_s26 }
 0x1c6   :  { %598 = vrot.lane.b32.xlu0 %v574_v25, %s1531_s0  ;;  %578 = vrot.lane.b32.xlu1 %v574_v25, %s1530_s25 }
 0x1c7   :  { %786 = vperm.xlu2 %1436, %v783_v15  }
 0x1cf   :  { %877 = vperm.xlu2 %1436, %v874_v20  }
 0x1d1   :  { %v729_v61 = vpop.permute.xlu2 %728 }
 0x1d9   :  { %v1987_v54 = vpop.permute.xlu2 %640 }
 0x1e1   :  { %v1989_v0 = vpop.permute.xlu2 %620 }
 0x1e8   :  { %v1991_v52 = vpop.permute.xlu0 %666  ;;  %v727_v4 = vpop.permute.xlu1 %726 }
 0x1e9   :  { %v669_v6 = vpop.permute.xlu2 %668  ;;  %v736_v7 = vsel %vm434_vm7, %v727_v4, %v729_v61 }
 0x1ea   :  { %v676_v26 = vsel %vm302_vm5, %v1991_v52, %v669_v6  ;;  %v738_v63 = vmul.f32 %v1874_v29, %v736_v7 }
 0x1eb   :  { %v678_v31 = vmul.f32 %v676_v26, %v307_v14 }
 0x1ec   :  { %800 = vmatpush.msrb.mxu0 %v738_v63 }
 0x1f0   :  { %v2001_v33 = vpop.permute.xlu0 %600  ;;  %v707_v37 = vpop.permute.xlu1 %706 }
 0x1f1   :  { %v711_v38 = vpop.permute.xlu2 %710 }
 0x1f8   :  { %v2003_v45 = vpop.permute.xlu0 %580  ;;  %v687_v51 = vpop.permute.xlu1 %686 }
 0x1f9   :  { %v691_v27 = vpop.permute.xlu2 %690 }
 0x200   :  { %v639_v3 = vpop.permute.xlu0 %638  ;;  %v709_v48 = vpop.permute.xlu1 %708 }
 0x201   :  { %v2005_v25 = vpop.permute.xlu2 %670  ;;  %v648_v29 = vsel %vm220_vm4, %v639_v3, %v1987_v54  ;;  %v715_v14 = vsel %vm386_vm8, %v709_v48, %v711_v38  ;;  %v716_v62 = vsel %vm386_vm8, %v707_v37, %v709_v48 }
 0x202   :  { %v675_v15 = vsel %vm302_vm5, %v669_v6, %v2005_v25  ;;  %v651_v20 = vmul.f32 %v648_v29, %v226_v34  ;;  %v718_v7 = vmul.f32 %v716_v62, %v391_v10  ;;  %v719_v63 = vmul.f32 %v715_v14, %v392_v57 }
 0x203   :  { %v679_v26 = vmul.f32 %v675_v15, %v308_v19 }
 0x204   :  { %655 = vst [vmem:[#allocation2 + $0x38] sm:$0xff] %v651_v20  ;;  %801 = vmatpush.msrb.mxu0 %v718_v7 }
 0x208   :  { %v731_v39 = vpop.permute.xlu0 %730  ;;  %v689_v48 = vpop.permute.xlu1 %688 }
 0x209   :  { %v2025_v23 = vpop.permute.xlu2 %624  ;;  %v735_v6 = vsel %vm434_vm7, %v729_v61, %v731_v39  ;;  %v695_v34 = vsel %vm350_vm6, %v689_v48, %v691_v27  ;;  %v696_v10 = vsel %vm350_vm6, %v687_v51, %v689_v48 }
 0x20a   :  { %v739_v19 = vmul.f32 %v1876_v35, %v735_v6  ;;  %v698_v57 = vmul.f32 %v696_v10, %v355_v11  ;;  %v699_v29 = vmul.f32 %v695_v34, %v356_v13 }
 0x20c   :  { %802 = vmatpush.msrb.mxu0 %v698_v57  ;;  %820 = vmatpush.msrb.mxu1 %v739_v19 }
 0x20e   :  { %803 = vmatpush.msrb.mxu0 %v678_v31  ;;  %821 = vmatpush.msrb.mxu1 %v719_v63 }
 0x210   :  { %v713_v14 = vpop.permute.xlu0 %712  ;;  %v733_v61 = vpop.permute.xlu1 %732  ;;  %822 = vmatpush.msrb.mxu1 %v699_v29  ;;  %804 = vmatpush.msrb.mxu0 %v1943_v18 }
 0x211   :  { %v2039_v62 = vpop.permute.xlu2 %604  ;;  %v714_v35 = vsel %vm386_vm8, %v711_v38, %v713_v14  ;;  %v717_v11 = vsel %vm386_vm8, %v713_v14, %v707_v37  ;;  %v734_v13 = vsel %vm434_vm7, %v731_v39, %v733_v61  ;;  %v737_v31 = vsel %vm434_vm7, %v733_v61, %v727_v4 }
 0x212   :  { %v720_v15 = vmul.f32 %v714_v35, %v393_v41  ;;  %v721_v18 = vmul.f32 %v717_v11, %v394_v22  ;;  %v740_v7 = vmul.f32 %v1782_v60, %v734_v13  ;;  %v741_v63 = vmul.f32 %v1822_v49, %v737_v31  ;;  %823 = vmatpush.msrb.mxu1 %v679_v26 }
 0x214   :  { %824 = vmatpush.msrb.mxu1 %v1948_v12  ;;  %840 = vmatpush.msrb.mxu2 %v740_v7 }
 0x215   :  { %860 = vmatpush.msrb.mxu3 %v741_v63 }
 0x216   :  { %825 = vmatpush.msrb.mxu1 %v651_v20  ;;  %841 = vmatpush.msrb.mxu2 %v720_v15 }
 0x217   :  { %861 = vmatpush.msrb.mxu3 %v721_v18 }
 0x218   :  { %v693_v39 = vpop.permute.xlu0 %692  ;;  %v645_v4 = vpop.permute.xlu1 %644 }
 0x219   :  { %v619_v37 = vpop.permute.xlu2 %618  ;;  %v694_v41 = vsel %vm350_vm6, %v691_v27, %v693_v39  ;;  %v697_v22 = vsel %vm350_vm6, %v693_v39, %v687_v51  ;;  %v649_v60 = vsel %vm220_vm4, %v645_v4, %v639_v3 }
 0x21a   :  { %v628_v49 = vsel %vm184_vm3, %v619_v37, %v1989_v0  ;;  %v629_v12 = vsel %vm184_vm3, %v2025_v23, %v619_v37  ;;  %v700_v38 = vmul.f32 %v694_v41, %v357_v55  ;;  %v701_v27 = vmul.f32 %v697_v22, %v358_v53 }
 0x21b   :  { %v630_v51 = vmul.f32 %v629_v12, %v189_v47  ;;  %v631_v3 = vmul.f32 %v628_v49, %v190_v36  ;;  %v650_v20 = vmul.f32 %v649_v60, %v225_v1 }
 0x21c   :  { %842 = vmatpush.msrb.mxu2 %v700_v38  ;;  %862 = vmatpush.msrb.mxu3 %v701_v27 }
 0x21d   :  { %634 = vst [vmem:[#allocation2 + $0x80] sm:$0xff] %v630_v51  ;;  %805 = vmatpush.msrb.mxu0 %v650_v20  ;;  %826 = vmatpush.msrb.mxu1 %v631_v3 }
 0x21e   :  { %635 = vst [vmem:[#allocation2 + $0x110] sm:$0xff] %v631_v3 }
 0x21f   :  { %806 = vmatpush.msrb.mxu0 %v630_v51  ;;  %654 = vst [vmem:[#allocation2 + $0xf8] sm:$0xff] %v650_v20  ;;  %v1284_v51 = vld [vmem:[#allocation6 + $0x178] sm:$0xff] }
 0x220   :  { %v673_v55 = vpop.permute.xlu0 %672  ;;  %v603_v26 = vpop.permute.xlu1 %602 }
 0x221   :  { %v674_v53 = vsel %vm302_vm5, %v2005_v25, %v673_v55  ;;  %v677_v47 = vsel %vm302_vm5, %v673_v55, %v1991_v52  ;;  %v606_v1 = vsel %vm136_vm2, %v603_v26, %v2039_v62  ;;  %v607_v36 = vsel %vm136_vm2, %v2001_v33, %v603_v26  ;;  %v1442_v26 = vld [vmem:[#allocation3 + $0x8] sm:$0xff] }
 0x222   :  { %v680_v48 = vmul.f32 %v674_v53, %v309_v43  ;;  %v681_v6 = vmul.f32 %v677_v47, %v310_v42  ;;  %v612_v25 = vmul.f32 %v607_v36, %v143_v5  ;;  %v613_v52 = vmul.f32 %v606_v1, %v144_v2  ;;  %v1283_v53 = vld [vmem:[#allocation6 + $0x170] sm:$0xff] }
 0x223   :  { %vm982_vm12 = vcmp.ne.f32.partialorder %v1442_v26, 0.0  ;;  %v2676_v47 = vmov 0   ;;  %v1445_v26 = vld [vmem:[#allocation3 + $0x18] sm:$0xff] }
 0x224   :  { %843 = vmatpush.msrb.mxu2 %v680_v48  ;;  %863 = vmatpush.msrb.mxu3 %v681_v6  ;;  %616 = vst [vmem:[#allocation2 + $0x30] sm:$0xff] %v612_v25  ;;  %v2256_v1 = vsel %vm982_vm12, 1, %v2676_v47  ;;  %v1282_v48 = vld [vmem:[#allocation6 + $0x168] sm:$0xff]  ;;  %v1281_v6 = vld [vmem:[#allocation6 + $0x160] sm:$0xff] }
 0x225   :  { %617 = vst [vmem:[#allocation2 + $0x18] sm:$0xff] %v613_v52  ;;  %v1002_v36 = vperm.slane %v2256_v1, 0 }
 0x226   :  { %844 = vmatpush.msrb.mxu2 %v1931_v40  ;;  %864 = vmatpush.msrb.mxu3 %v1936_v50 }
 0x227   :  { %vm2266_vm13 = vcmp.eq.s32.totalorder %v1002_v36, 1  ;;  %v1296_v36 = vld [vmem:[#allocation6 + $0x1d8] sm:$0xff] }
 0x228   :  { %v643_v34 = vpop.permute.xlu0 %642  ;;  %v583_v10 = vpop.permute.xlu1 %582 }
 0x229   :  { %v646_v43 = vsel %vm220_vm4, %v643_v34, %v645_v4  ;;  %v647_v5 = vsel %vm220_vm4, %v1987_v54, %v643_v34  ;;  %v587_v2 = vsel %vm100_vm1, %v2003_v45, %v583_v10  ;;  %v1300_v34 = vld [vmem:[#allocation6 + $0x1f8] sm:$0xff] }
 0x22a   :  { %v652_v42 = vmul.f32 %v647_v5, %v227_v32  ;;  %v653_v40 = vmul.f32 %v646_v43, %v228_v30  ;;  %v592_v50 = vmul.f32 %v587_v2, %v107_v59  ;;  %v1280_v43 = vld [vmem:[#allocation6 + $0x158] sm:$0xff] }
 0x22b   :  { %v1264_v2 = vld [vmem:[#allocation6 + $0xd8] sm:$0xff] }
 0x22c   :  { %656 = vst [vmem:[#allocation2 + $0x8] sm:$0xff] %v652_v42  ;;  %845 = vmatpush.msrb.mxu2 %v652_v42  ;;  %865 = vmatpush.msrb.mxu3 %v653_v40 }
 0x22d   :  { %657 = vst [vmem:[#allocation2 + $0x78] sm:$0xff] %v653_v40  ;;  %v1054_v40 = vperm.slane %v2256_v1, 2 }
 0x22e   :  { %596 = vst [vmem:[#allocation2 + $0x10] sm:$0xff] %v592_v50 }
 0x230   :  { %v623_v19 = vpop.permute.xlu0 %622  ;;  %v585_v54 = vpop.permute.xlu1 %584 }
 0x231   :  { %v626_v57 = vsel %vm184_vm3, %v623_v19, %v2025_v23  ;;  %v627_v32 = vsel %vm184_vm3, %v1989_v0, %v623_v19  ;;  %v586_v30 = vsel %vm100_vm1, %v583_v10, %v585_v54  ;;  %v746_v23 = vld [vmem:[%s2667_s5] sm:$0xff]  ;;  %v888_v0 = vld.sshfl [vmem:[#allocation1 + $0x18] sm:$0xff pattern:$0x75316420]  ;;  %v1026_v10 = vperm.slane %v2256_v1, 1 }
 0x232   :  { %v632_v59 = vmul.f32 %v627_v32, %v191_v24  ;;  %v633_v29 = vmul.f32 %v626_v57, %v192_v21  ;;  %v593_v14 = vmul.f32 %v586_v30, %v108_v58  ;;  %v887_v21 = vld.sshfl [vmem:[#allocation1 + $0x10] sm:$0xff pattern:$0x75316420]  ;;  %v1082_v57 = vperm.slane %v2256_v1, 3  ;;  %v1252_v32 = vld [vmem:[#allocation6 + $0x78] sm:$0xff] }
 0x233   :  { %vm2275_vm15 = vcmp.eq.s32.totalorder %v1026_v10, 1  ;;  %v1268_v30 = vld [vmem:[#allocation6 + $0xf8] sm:$0xff] }
 0x234   :  { %636 = vst [vmem:[#allocation2 + $0x118] sm:$0xff] %v632_v59  ;;  %846 = vmatpush.msrb.mxu2 %v632_v59  ;;  %866 = vmatpush.msrb.mxu3 %v633_v29  ;;  %v1279_v59 = vld [vmem:[#allocation6 + $0x150] sm:$0xff]  ;;  %vm2299_vm9 = vcmp.eq.s32.totalorder %v1082_v57, 1 }
 0x235   :  { %637 = vst [vmem:[#allocation2 + $0x98] sm:$0xff] %v633_v29  ;;  %v1247_v57 = vld [vmem:[#allocation6 + $0x50] sm:$0xff] }
 0x236   :  { %597 = vst [vmem:[#allocation2 + $0x48] sm:$0xff] %v593_v14  ;;  %847 = vmatpush.msrb.mxu2 %v612_v25  ;;  %867 = vmatpush.msrb.mxu3 %v613_v52 }
 0x238   :  { %v599_v16 = vpop.permute.xlu0 %598  ;;  %v579_v24 = vpop.permute.xlu1 %578  ;;  %848 = vmatpush.msrb.mxu2 %v592_v50  ;;  %868 = vmatpush.msrb.mxu3 %v593_v14  ;;  %v1443_v50 = vld [vmem:[#allocation3] sm:$0xff]  ;;  %v1299_v14 = vld [vmem:[#allocation6 + $0x1f0] sm:$0xff] }
 0x239   :  { %v608_v8 = vsel %vm136_vm2, %v599_v16, %v2001_v33  ;;  %v609_v58 = vsel %vm136_vm2, %v2039_v62, %v599_v16  ;;  %v588_v61 = vsel %vm100_vm1, %v579_v24, %v2003_v45  ;;  %v589_v35 = vsel %vm100_vm1, %v585_v54, %v579_v24  ;;  %1410 = vmatmul.msk.f32.vlgmr.msrb.gmra.mxu2 %vm789_vm10, %v746_v23  ;;  %v885_v45 = vld.sshfl [vmem:[#allocation1] sm:$0xff pattern:$0x75316420]  ;;  %v1267_v16 = vld [vmem:[#allocation6 + $0xf0] sm:$0xff] }
 0x23a   :  { %v610_v11 = vmul.f32 %v609_v58, %v141_v44  ;;  %v611_v13 = vmul.f32 %v608_v8, %v142_v46  ;;  %v590_v33 = vmul.f32 %v589_v35, %v105_v28  ;;  %1411 = vmatmul.msk.f32.vlgmr.msrb.gmra.mxu3 %vm789_vm10, %v746_v23  ;;  %v2675_v62 = vperm.slane %v1623_v9, 0  ;;  %1416 = vmatpush.msk.msra.mxu2 %vm259_vm0, %v887_v21  ;;  %v886_v44 = vld.sshfl [vmem:[#allocation1 + $0x8] sm:$0xff pattern:$0x75316420]  ;;  %v787_v9 = vpop.permute.xlu2 %786  ;;  %v1298_v8 = vld [vmem:[#allocation6 + $0x1e8] sm:$0xff] }
 0x23b   :  { %1418 = vmatpush.msk.msra.mxu3 %vm259_vm0, %v888_v0  ;;  %vm981_vm14 = vcmp.ne.f32.partialorder %v1443_v50, 0.0  ;;  %v1278_v0 = vld [vmem:[#allocation6 + $0x148] sm:$0xff] }
 0x23c   :  { %v591_v31 = vmul.f32 %v588_v61, %v2675_v62  ;;  %614 = vst [vmem:[#allocation2 + $0x108] sm:$0xff] %v610_v11  ;;  %807 = vmatpush.msrb.mxu0 %v610_v11  ;;  %827 = vmatpush.msrb.mxu1 %v611_v13  ;;  %v2287_v24 = vsel %vm981_vm14, 1, %v2676_v47  ;;  %v1250_v58 = vld [vmem:[#allocation6 + $0x68] sm:$0xff]  ;;  %v1297_v62 = vld [vmem:[#allocation6 + $0x1e0] sm:$0xff] }
 0x23d   :  { %615 = vst [vmem:[#allocation2 + $0x68] sm:$0xff] %v611_v13  ;;  %1341 = vmatpush.msrb.mxu2 %v1284_v51  ;;  %1361 = vmatpush.msrb.mxu3 %v1300_v34  ;;  %v1266_v13 = vld [vmem:[#allocation6 + $0xe8] sm:$0xff]  ;;  %v1276_v51 = vld [vmem:[#allocation6 + $0x138] sm:$0xff] }
 0x23e   :  { %594 = vst [vmem:[#allocation2 + $0xb0] sm:$0xff] %v590_v33  ;;  %808 = vmatpush.msrb.mxu0 %v590_v33  ;;  %828 = vmatpush.msrb.mxu1 %v591_v31  ;;  %v1277_v33 = vld [vmem:[#allocation6 + $0x140] sm:$0xff] }
 0x23f   :  { %595 = vst [vmem:[#allocation2 + $0xd0] sm:$0xff] %v591_v31  ;;  %1408 = vmatmul.msk.f32.vlgmr.msrb.gmra.mxu0 %vm789_vm10, %v746_v23  ;;  %1409 = vmatmul.msk.f32.vlgmr.msrb.gmra.mxu1 %vm789_vm10, %v746_v23  ;;  %v1251_v23 = vld [vmem:[#allocation6 + $0x70] sm:$0xff] }
 0x240   :  { %1412 = vmatpush.msk.msra.mxu0 %vm259_vm0, %v885_v45  ;;  %1414 = vmatpush.msk.msra.mxu1 %vm259_vm0, %v886_v44  ;;  %vm2289_vm0 = vcmp.eq.s32.totalorder %v1054_v40, 1  ;;  %v1025_v40 = vperm.slane %v2287_v24, 1 }
 0x241   :  { %1417 = vmatmul.msk.f32.vlgmr.msra.gmra.mxu2 %vm889_vm11, %v873_v17  ;;  %1362 = vmatpush.msrb.mxu3 %v1299_v14  ;;  %v1246_v14 = vld [vmem:[#allocation6 + $0x48] sm:$0xff] }
 0x242   :  { %1419 = vmatmul.msk.f32.vlgmr.msra.gmra.mxu3 %vm889_vm11, %v873_v17  ;;  %v2233_v37 = vpop.permute.xlu2 %877  ;;  %1342 = vmatpush.msrb.mxu2 %v1283_v53 }
 0x243   :  { %1301 = vmatpush.msrb.mxu0 %v1252_v32  ;;  %1321 = vmatpush.msrb.mxu1 %v1268_v30  ;;  %v1263_v32 = vld [vmem:[#allocation6 + $0xd0] sm:$0xff]  ;;  %v1001_v30 = vperm.slane %v2287_v24, 0 }
 0x244   :  { %1343 = vmatpush.msrb.mxu2 %v1282_v48  ;;  %1363 = vmatpush.msrb.mxu3 %v1298_v8 }
 0x245   :  { %1302 = vmatpush.msrb.mxu0 %v1251_v23  ;;  %1322 = vmatpush.msrb.mxu1 %v1267_v16  ;;  %v1081_v23 = vperm.slane %v2287_v24, 3  ;;  %vm2356_vm14 = vcmp.eq.s32.totalorder %v1001_v30, 1 }
 0x246   :  { %1344 = vmatpush.msrb.mxu2 %v1281_v6  ;;  %1364 = vmatpush.msrb.mxu3 %v1297_v62 }
 0x247   :  { %1413 = vmatmul.msk.f32.vlgmr.msra.gmra.mxu0 %vm889_vm11, %v873_v17  ;;  %1415 = vmatmul.msk.f32.vlgmr.msra.gmra.mxu1 %vm889_vm11, %v873_v17  ;;  %vm984_vm11 = vcmp.ne.f32.partialorder %v1445_v26, 0.0 }
 0x248   :  { %1345 = vmatpush.msrb.mxu2 %v1280_v43  ;;  %1303 = vmatpush.msrb.mxu0 %v1250_v58  ;;  %v1248_v43 = vld [vmem:[#allocation6 + $0x58] sm:$0xff]  ;;  %v2327_v50 = vsel %vm984_vm11, 1, %v2676_v47  ;;  %v1262_v58 = vld [vmem:[#allocation6 + $0xc8] sm:$0xff] }
 0x249   :  { %1323 = vmatpush.msrb.mxu1 %v1266_v13  ;;  %1365 = vmatpush.msrb.mxu3 %v1296_v36  ;;  %v1293_v13 = vld [vmem:[#allocation6 + $0x1c0] sm:$0xff]  ;;  %v1100_v31 = vperm.slane %v2327_v50, 4  ;;  %v1084_v36 = vperm.slane %v2327_v50, 3 }
 0x24a   :  { %1346 = vmatpush.msrb.mxu2 %v1279_v59  ;;  %v1274_v59 = vld [vmem:[#allocation6 + $0x128] sm:$0xff] }
 0x24c   :  { %1347 = vmatpush.msrb.mxu2 %v1278_v0 }
 0x24e   :  { %1348 = vmatpush.msrb.mxu2 %v1277_v33  ;;  %v1004_v33 = vperm.slane %v2327_v50, 0 }
 0x250   :  { %1349 = vmatpush.msrb.mxu2 %v1276_v51  ;;  %v1258_v51 = vld [vmem:[#allocation6 + $0xa8] sm:$0xff] }
 0x2bc   :  { %v810_v46 = vpop.f32.mrf.mxu0  ;;  %v830_v15 = vpop.f32.mrf.mxu1 }
 0x2bd   :  { %v2161_v28 = vadd.f32 %v810_v46, %v787_v9  ;;  %v2175_v18 = vadd.f32 %v830_v15, %v787_v9  ;;  %v850_v7 = vpop.f32.mrf.mxu2  ;;  %v870_v39 = vpop.f32.mrf.mxu3  ;;  %v1265_v46 = vld [vmem:[#allocation6 + $0xe0] sm:$0xff]  ;;  %v1444_v15 = vld [vmem:[#allocation3 + $0x10] sm:$0xff] }
 0x2be   :  { %v2183_v63 = vadd.f32 %v850_v7, %v787_v9  ;;  %v2191_v4 = vadd.f32 %v870_v39, %v787_v9  ;;  %v1249_v9 = vld [vmem:[#allocation6 + $0x60] sm:$0xff]  ;;  %vm983_vm10 = vcmp.ne.f32.partialorder %v1444_v15, 0.0  ;;  %v1097_v39 = vperm.slane %v2287_v24, 4  ;;  %1324 = vmatpush.msrb.mxu1 %v1265_v46 }
 0x2bf   :  { %1041 = vrot.lane.b32.xlu1 %v2161_v28, %s1532_s26  ;;  %1013 = vrot.lane.b32.xlu0 %v2161_v28, %s1531_s0  ;;  %v2320_v34 = vsel %vm983_vm10, 1, %v2676_v47  ;;  %v1153_v46 = vperm.slane %v2287_v24, 6 }
 0x2c0   :  { %985 = vrot.lane.b32.xlu2 %v2161_v28, %s1530_s25  ;;  %1304 = vmatpush.msrb.mxu0 %v1249_v9  ;;  %vm2329_vm12 = vcmp.eq.s32.totalorder %v1097_v39, 1  ;;  %v1003_v16 = vperm.slane %v2320_v34, 0  ;;  %v1099_v8 = vperm.slane %v2320_v34, 4  ;;  %v1055_v15 = vperm.slane %v2320_v34, 2  ;;  %v1292_v39 = vld [vmem:[#allocation6 + $0x1b8] sm:$0xff] }
 0x2c1   :  { %1325 = vmatpush.msrb.mxu1 %v1264_v2  ;;  %v1105_v62 = vsel %vm2329_vm12, %v2161_v28, -3e+38  ;;  %v1028_v2 = vperm.slane %v2327_v50, 1 }
 0x2c2   :  { %1305 = vmatpush.msrb.mxu0 %v1248_v43  ;;  %v1128_v43 = vperm.slane %v2327_v50, 5  ;;  %vm2384_vm10 = vcmp.eq.s32.totalorder %v1055_v15, 1 }
 0x2c3   :  { %1326 = vmatpush.msrb.mxu1 %v1263_v32 }
 0x2c4   :  { %1306 = vmatpush.msrb.mxu0 %v1247_v57  ;;  %v1271_v57 = vld [vmem:[#allocation6 + $0x110] sm:$0xff] }
 0x2c5   :  { %1327 = vmatpush.msrb.mxu1 %v1262_v58 }
 0x2c6   :  { %1307 = vmatpush.msrb.mxu0 %v1246_v14  ;;  %v1259_v14 = vld [vmem:[#allocation6 + $0xb0] sm:$0xff] }
 0x2c7   :  { %1141 = vrot.lane.b32.xlu1 %v2161_v28, %s1535_s29  ;;  %1069 = vrot.lane.b32.xlu0 %v2161_v28, %s1533_s27 }
 0x2c8   :  { %1169 = vrot.lane.b32.xlu2 %v2161_v28, %s1536_s30 }
 0x2cf   :  { %1143 = vrot.lane.b32.xlu1 %v2175_v18, %s1535_s29  ;;  %1113 = vrot.lane.b32.xlu0 %v2161_v28, %s1534_s28 }
 0x2d0   :  { %1015 = vrot.lane.b32.xlu2 %v2175_v18, %s1531_s0 }
 0x2d7   :  { %989 = vrot.lane.b32.xlu1 %v2183_v63, %s1530_s25  ;;  %987 = vrot.lane.b32.xlu0 %v2175_v18, %s1530_s25 }
 0x2d8   :  { %1071 = vrot.lane.b32.xlu2 %v2175_v18, %s1533_s27 }
 0x2df   :  { %991 = vrot.lane.b32.xlu1 %v2191_v4, %s1530_s25  ;;  %1043 = vrot.lane.b32.xlu0 %v2175_v18, %s1532_s26 }
 0x2e0   :  { %1019 = vrot.lane.b32.xlu2 %v2191_v4, %s1531_s0 }
 0x2e7   :  { %1045 = vrot.lane.b32.xlu1 %v2183_v63, %s1532_s26  ;;  %1115 = vrot.lane.b32.xlu0 %v2175_v18, %s1534_s28 }
 0x2e8   :  { %1075 = vrot.lane.b32.xlu2 %v2191_v4, %s1533_s27 }
 0x2ef   :  { %1047 = vrot.lane.b32.xlu1 %v2191_v4, %s1532_s26  ;;  %1017 = vrot.lane.b32.xlu0 %v2183_v63, %s1531_s0 }
 0x2f0   :  { %1119 = vrot.lane.b32.xlu2 %v2191_v4, %s1534_s28 }
 0x2f7   :  { %1117 = vrot.lane.b32.xlu1 %v2183_v63, %s1534_s28  ;;  %1073 = vrot.lane.b32.xlu0 %v2183_v63, %s1533_s27 }
 0x2f8   :  { %1147 = vrot.lane.b32.xlu2 %v2191_v4, %s1535_s29 }
 0x2ff   :  { %1145 = vrot.lane.b32.xlu1 %v2183_v63, %s1535_s29  ;;  %1175 = vrot.lane.b32.xlu0 %v2191_v4, %s1536_s30 }
 0x300   :  { %1173 = vrot.lane.b32.xlu2 %v2183_v63, %s1536_s30 }
 0x307   :  { %1207 = vrot.lane.b32.xlu1 %v2191_v4, %s1537_s10  ;;  %1205 = vrot.lane.b32.xlu0 %v2183_v63, %s1537_s10 }
 0x308   :  { %1203 = vrot.lane.b32.xlu2 %v2175_v18, %s1537_s10 }
 0x30f   :  { %1201 = vrot.lane.b32.xlu1 %v2161_v28, %s1537_s10  ;;  %1171 = vrot.lane.b32.xlu0 %v2175_v18, %s1536_s30 }
 0x31a   :  { %v2235_v41 = vpop.permute.xlu2 %985 }
 0x322   :  { %v2237_v22 = vpop.permute.xlu2 %1169 }
 0x32a   :  { %v2243_v12 = vpop.permute.xlu2 %1015 }
 0x331   :  { %v2239_v60 = vpop.permute.xlu1 %1041  ;;  %v2241_v49 = vpop.permute.xlu0 %1013 }
 0x332   :  { %v2253_v55 = vpop.permute.xlu2 %1071  ;;  %v1023_v54 = vsel %vm136_vm2, %v2241_v49, %v2243_v12 }
 0x333   :  { %v1034_v61 = vsel %vm2275_vm15, %v1023_v54, -3e+38  ;;  %v1295_v54 = vld [vmem:[#allocation6 + $0x1d0] sm:$0xff]  ;;  %vm2366_vm15 = vcmp.eq.s32.totalorder %v1081_v23, 1 }
 0x334   :  { %1366 = vmatpush.msrb.mxu3 %v1295_v54  ;;  %v1260_v54 = vld [vmem:[#allocation6 + $0xb8] sm:$0xff] }
 0x339   :  { %v2245_v38 = vpop.permute.xlu1 %1141  ;;  %v2247_v27 = vpop.permute.xlu0 %1069 }
 0x33a   :  { %v2264_v5 = vpop.permute.xlu2 %1019  ;;  %v1079_v45 = vsel %vm220_vm4, %v2247_v27, %v2253_v55 }
 0x33b   :  { %v1090_v48 = vsel %vm2299_vm9, %v1079_v45, -3e+38  ;;  %v1245_v45 = vld [vmem:[#allocation6 + $0x40] sm:$0xff]  ;;  %v1024_v9 = vsel %vm136_vm2, %v2264_v5, %v2241_v49  ;;  %v1027_v49 = vperm.slane %v2320_v34, 1  ;;  %vm2378_vm9 = vcmp.eq.s32.totalorder %v1004_v33, 1  ;;  %v1290_v33 = vld [vmem:[#allocation6 + $0x1a8] sm:$0xff] }
 0x33c   :  { %1308 = vmatpush.msrb.mxu0 %v1245_v45  ;;  %v1242_v45 = vld [vmem:[#allocation6 + $0x28] sm:$0xff] }
 0x341   :  { %v2249_v3 = vpop.permute.xlu1 %1143  ;;  %v2251_v20 = vpop.permute.xlu0 %1113 }
 0x342   :  { %v2316_v6 = vpop.permute.xlu2 %1075 }
 0x349   :  { %v2259_v25 = vpop.permute.xlu1 %989  ;;  %v2261_v52 = vpop.permute.xlu0 %987 }
 0x34a   :  { %v995_v42 = vsel %vm100_vm1, %v2235_v41, %v2261_v52  ;;  %v2388_v23 = vpop.permute.xlu2 %1119 }
 0x34b   :  { %v1010_v29 = vsel %vm2266_vm13, %v995_v42, -3e+38  ;;  %v1275_v42 = vld [vmem:[#allocation6 + $0x130] sm:$0xff]  ;;  %vm2346_vm13 = vcmp.eq.s32.totalorder %v1025_v40, 1  ;;  %v1244_v40 = vld [vmem:[#allocation6 + $0x38] sm:$0xff] }
 0x34c   :  { %v1038_v44 = vmax.f32 %v1010_v29, %v1034_v61  ;;  %1350 = vmatpush.msrb.mxu2 %v1275_v42  ;;  %v1294_v29 = vld [vmem:[#allocation6 + $0x1c8] sm:$0xff]  ;;  %v1273_v61 = vld [vmem:[#allocation6 + $0x120] sm:$0xff]  ;;  %1309 = vmatpush.msrb.mxu0 %v1244_v40 }
 0x34d   :  { %1367 = vmatpush.msrb.mxu3 %v1294_v29  ;;  %v1243_v29 = vld [vmem:[#allocation6 + $0x30] sm:$0xff] }
 0x34e   :  { %1351 = vmatpush.msrb.mxu2 %v1274_v59  ;;  %v1291_v59 = vld [vmem:[#allocation6 + $0x1b0] sm:$0xff]  ;;  %1310 = vmatpush.msrb.mxu0 %v1243_v29 }
 0x34f   :  { %1368 = vmatpush.msrb.mxu3 %v1293_v13  ;;  %v1270_v13 = vld [vmem:[#allocation6 + $0x108] sm:$0xff] }
 0x350   :  { %1352 = vmatpush.msrb.mxu2 %v1273_v61  ;;  %1311 = vmatpush.msrb.mxu0 %v1242_v45 }
 0x351   :  { %v2295_v35 = vpop.permute.xlu1 %991  ;;  %v2297_v11 = vpop.permute.xlu0 %1043  ;;  %1369 = vmatpush.msrb.mxu3 %v1292_v39 }
 0x352   :  { %v1051_v17 = vsel %vm184_vm3, %v2239_v60, %v2297_v11  ;;  %v996_v26 = vsel %vm100_vm1, %v2295_v35, %v2235_v41  ;;  %v1033_v41 = vsel %vm2346_vm13, %v1024_v9, -3e+38  ;;  %vm2395_vm13 = vcmp.eq.s32.totalorder %v1027_v49, 1  ;;  %v1241_v49 = vld [vmem:[#allocation6 + $0x20] sm:$0xff] }
 0x353   :  { %v1062_v7 = vsel %vm2289_vm0, %v1051_v17, -3e+38  ;;  %vm2370_vm0 = vcmp.eq.s32.totalorder %v1003_v16, 1  ;;  %v1009_v32 = vsel %vm2356_vm14, %v996_v26, -3e+38  ;;  %v1125_v16 = vperm.slane %v2287_v24, 5  ;;  %1370 = vmatpush.msrb.mxu3 %v1291_v59  ;;  %1312 = vmatpush.msrb.mxu0 %v1241_v49 }
 0x354   :  { %v1066_v53 = vmax.f32 %v1038_v44, %v1062_v7  ;;  %v1261_v44 = vld [vmem:[#allocation6 + $0xc0] sm:$0xff]  ;;  %v1272_v7 = vld [vmem:[#allocation6 + $0x118] sm:$0xff]  ;;  %v994_v17 = vsel %vm100_vm1, %v2261_v52, %v2259_v25  ;;  %v993_v9 = vsel %vm100_vm1, %v2259_v25, %v2295_v35  ;;  %vm2411_vm14 = vcmp.eq.s32.totalorder %v1028_v2, 1 }
 0x355   :  { %1328 = vmatpush.msrb.mxu1 %v1261_v44  ;;  %1353 = vmatpush.msrb.mxu2 %v1272_v7  ;;  %v1080_v44 = vsel %vm220_vm4, %v2316_v6, %v2247_v27  ;;  %v1269_v27 = vld [vmem:[#allocation6 + $0x100] sm:$0xff]  ;;  %v1037_v26 = vmax.f32 %v1009_v32, %v1033_v41  ;;  %v1056_v2 = vperm.slane %v2327_v50, 2  ;;  %vm2431_vm1 = vcmp.eq.s32.totalorder %v1099_v8, 1  ;;  %v1288_v59 = vld [vmem:[#allocation6 + $0x198] sm:$0xff]  ;;  %v1255_v7 = vld [vmem:[#allocation6 + $0x90] sm:$0xff] }
 0x356   :  { %v2322_v10 = vmax.f32 %v1066_v53, %v1090_v48  ;;  %v1053_v53 = vperm.slane %v2287_v24, 2  ;;  %v1289_v35 = vld [vmem:[#allocation6 + $0x1a0] sm:$0xff]  ;;  %1371 = vmatpush.msrb.mxu3 %v1290_v33  ;;  %v1083_v8 = vperm.slane %v2320_v34, 3  ;;  %v1012_v29 = vsel %vm2378_vm9, %v993_v9, -3e+38  ;;  %v1287_v33 = vld [vmem:[#allocation6 + $0x190] sm:$0xff] }
 0x357   :  { %1329 = vmatpush.msrb.mxu1 %v1260_v54  ;;  %1354 = vmatpush.msrb.mxu2 %v1271_v57  ;;  %v1089_v54 = vsel %vm2366_vm15, %v1080_v44, -3e+38  ;;  %vm2465_vm15 = vcmp.eq.s32.totalorder %v1153_v46, 1  ;;  %v1239_v9 = vld [vmem:[#allocation6 + $0x10] sm:$0xff]  ;;  %vm2478_vm9 = vcmp.eq.s32.totalorder %v1128_v43, 1  ;;  %v1151_v43 = vsel %vm350_vm6, %v2245_v38, %v2249_v3 }
 0x358   :  { %vm2391_vm11 = vcmp.eq.s32.totalorder %v1053_v53, 1  ;;  %1372 = vmatpush.msrb.mxu3 %v1289_v35 }
 0x359   :  { %v2336_v21 = vpop.permute.xlu1 %1045  ;;  %v2338_v0 = vpop.permute.xlu0 %1115  ;;  %1330 = vmatpush.msrb.mxu1 %v1259_v14  ;;  %1355 = vmatpush.msrb.mxu2 %v1270_v13  ;;  %v1256_v13 = vld [vmem:[#allocation6 + $0x98] sm:$0xff]  ;;  %v1124_v14 = vsel %vm302_vm5, %v2388_v23, %v2251_v20 }
 0x35a   :  { %v1050_v58 = vsel %vm184_vm3, %v2297_v11, %v2336_v21  ;;  %v1123_v48 = vsel %vm302_vm5, %v2251_v20, %v2338_v0  ;;  %1373 = vmatpush.msrb.mxu3 %v1288_v59  ;;  %v1253_v59 = vld [vmem:[#allocation6 + $0x80] sm:$0xff] }
 0x35b   :  { %1331 = vmatpush.msrb.mxu1 %v1258_v51  ;;  %1356 = vmatpush.msrb.mxu2 %v1269_v27  ;;  %v1238_v27 = vld [vmem:[#allocation6 + $0x8] sm:$0xff] }
 0x35c   :  { %1374 = vmatpush.msrb.mxu3 %v1287_v33 }
 0x361   :  { %v1048_v15 = vpop.permute.xlu1 %1047  ;;  %v1018_v39 = vpop.permute.xlu0 %1017 }
 0x362   :  { %v1052_v52 = vsel %vm184_vm3, %v1048_v15, %v2239_v60  ;;  %v1021_v53 = vsel %vm136_vm2, %v1018_v39, %v2264_v5  ;;  %v1022_v25 = vsel %vm136_vm2, %v2243_v12, %v1018_v39  ;;  %vm2437_vm2 = vcmp.eq.s32.totalorder %v1100_v31, 1  ;;  %v1257_v5 = vld [vmem:[#allocation6 + $0xa0] sm:$0xff] }
 0x363   :  { %v1061_v41 = vsel %vm2391_vm11, %v1052_v52, -3e+38  ;;  %v1035_v40 = vsel %vm2395_vm13, %v1022_v25, -3e+38  ;;  %v1036_v32 = vsel %vm2411_vm14, %v1021_v53, -3e+38  ;;  %1332 = vmatpush.msrb.mxu1 %v1257_v5  ;;  %v1049_v11 = vsel %vm184_vm3, %v2336_v21, %v1048_v15  ;;  %v1148_v5 = vpop.permute.xlu2 %1147 }
 0x364   :  { %v1065_v57 = vmax.f32 %v1037_v26, %v1061_v41  ;;  %v1011_v31 = vsel %vm2370_vm0, %v994_v17, -3e+38  ;;  %vm2450_vm11 = vcmp.eq.s32.totalorder %v1125_v16, 1  ;;  %v1240_v16 = vld [vmem:[#allocation6 + $0x18] sm:$0xff]  ;;  %vm2469_vm0 = vcmp.eq.s32.totalorder %v1056_v2, 1  ;;  %v1286_v15 = vld [vmem:[#allocation6 + $0x188] sm:$0xff] }
 0x365   :  { %v1039_v61 = vmax.f32 %v1011_v31, %v1035_v40  ;;  %v1040_v17 = vmax.f32 %v1012_v29, %v1036_v32  ;;  %1313 = vmatpush.msrb.mxu0 %v1240_v16  ;;  %v1156_v39 = vperm.slane %v2327_v50, 6  ;;  %vm2487_vm13 = vcmp.eq.s32.totalorder %v1083_v8, 1  ;;  %1333 = vmatpush.msrb.mxu1 %v1256_v13  ;;  %v1254_v53 = vld [vmem:[#allocation6 + $0x88] sm:$0xff]  ;;  %v1285_v2 = vld [vmem:[#allocation6 + $0x180] sm:$0xff]  ;;  %v73_v40 = vld [vmem:[#allocation3 + $0x30] sm:$0x1] }
 0x366   :  { %v1093_v42 = vmax.f32 %v1065_v57, %v1089_v54  ;;  %v1063_v26 = vsel %vm2384_vm10, %v1050_v58, -3e+38  ;;  %v1133_v19 = vsel %vm2450_vm11, %v1123_v48, -3e+38  ;;  %vm2501_vm3 = vcmp.eq.s32.totalorder %v1084_v36, 1  ;;  %v1237_v41 = vld [vmem:[#allocation6] sm:$0xff]  ;;  %1375 = vmatpush.msrb.mxu3 %v1286_v15 }
 0x367   :  { %1314 = vmatpush.msrb.mxu0 %v1239_v9  ;;  %v1064_v25 = vsel %vm2469_vm0, %v1049_v11, -3e+38  ;;  %v1067_v35 = vmax.f32 %v1039_v61, %v1063_v26  ;;  %1334 = vmatpush.msrb.mxu1 %v1255_v7  ;;  %v1127_v54 = vperm.slane %v2320_v34, 5  ;;  %v1155_v29 = vperm.slane %v2320_v34, 6 }
 0x368   :  { %v1109_v51 = vmax.f32 %v1093_v42, %v1105_v62  ;;  %v1068_v57 = vmax.f32 %v1040_v17, %v1064_v25  ;;  %v1184_v58 = vperm.slane %v2327_v50, 7  ;;  %1376 = vmatpush.msrb.mxu3 %v1285_v2  ;;  %v1107_v42 = vsel %vm2431_vm1, %v2183_v63, -3e+38  ;;  %v74_v17 = vld [vmem:[#allocation3 + $0x38] sm:$0x1] }
 0x369   :  { %v2499_v28 = vpop.permute.xlu1 %1117  ;;  %v1074_v52 = vpop.permute.xlu0 %1073  ;;  %1315 = vmatpush.msrb.mxu0 %v1238_v27  ;;  %1335 = vmatpush.msrb.mxu1 %v1254_v53  ;;  %v1108_v61 = vsel %vm2437_vm2, %v2191_v4, -3e+38  ;;  %vm2534_vm12 = vcmp.eq.s32.totalorder %v1156_v39, 1  ;;  %v1152_v20 = vsel %vm350_vm6, %v1148_v5, %v2245_v38  ;;  %vm2541_vm10 = vcmp.eq.s32.totalorder %v1127_v54, 1  ;;  %v71_v39 = vld [vmem:[#allocation3 + $0x20] sm:$0x1] }
 0x36a   :  { %v1077_v30 = vsel %vm220_vm4, %v1074_v52, %v2316_v6  ;;  %v1078_v49 = vsel %vm220_vm4, %v2253_v55, %v1074_v52  ;;  %v1137_v8 = vmax.f32 %v1109_v51, %v1133_v19  ;;  %v1161_v6 = vsel %vm2465_vm15, %v1151_v43, -3e+38  ;;  %v72_v27 = vld [vmem:[#allocation3 + $0x28] sm:$0x1] }
 0x36b   :  { %v1091_v32 = vsel %vm2487_vm13, %v1078_v49, -3e+38  ;;  %v1092_v55 = vsel %vm2501_vm3, %v1077_v30, -3e+38  ;;  %1316 = vmatpush.msrb.mxu0 %v1237_v41  ;;  %vm1199_vm4 = vcmp.ne.f32.partialorder %v73_v40, 0.0  ;;  %1336 = vmatpush.msrb.mxu1 %v1253_v59  ;;  %v1121_v4 = vsel %vm302_vm5, %v2499_v28, %v2388_v23  ;;  %v1174_v62 = vpop.permute.xlu2 %1173  ;;  %v958_v30 = vpop.f32.mrf.mxu2 }
 0x36c   :  { %v1095_v31 = vmax.f32 %v1067_v35, %v1091_v32  ;;  %v1096_v36 = vmax.f32 %v1068_v57, %v1092_v55  ;;  %v2526_v48 = vmax.f32 %v1137_v8, %v1161_v6  ;;  %v1136_v63 = vsel %vm2478_vm9, %v1124_v14, -3e+38 }
 0x36d   :  { %vm2551_vm14 = vcmp.eq.s32.totalorder %v1155_v29, 1  ;;  %vm2555_vm1 = vcmp.eq.s32.totalorder %v1184_v58, 1  ;;  %v1215_v11 = vsel %vm1199_vm4, 1, %v2676_v47  ;;  %v1164_v9 = vsel %vm2534_vm12, %v1152_v20, -3e+38 }
 0x36e   :  { %v1112_v60 = vmax.f32 %v1096_v36, %v1108_v61  ;;  %v1111_v12 = vmax.f32 %v1095_v31, %v1107_v42  ;;  %v1183_v7 = vperm.slane %v2320_v34, 7  ;;  %v1135_v51 = vsel %vm2541_vm10, %v1121_v4, -3e+38 }
 0x36f   :  { %v1219_v19 = vperm.slane %v1215_v11, 0  ;;  %v1098_v34 = vperm.slane %v2256_v1, 4  ;;  %vm1200_vm11 = vcmp.ne.f32.partialorder %v74_v17, 0.0  ;;  %v1126_v35 = vperm.slane %v2256_v1, 5 }
 0x370   :  { %v1140_v44 = vmax.f32 %v1112_v60, %v1136_v63  ;;  %v1139_v43 = vmax.f32 %v1111_v12, %v1135_v51  ;;  %vm1187_vm2 = vcmp.eq.s32.totalorder %v1183_v7, 1  ;;  %vm1198_vm15 = vcmp.ne.f32.partialorder %v72_v27, 0.0  ;;  %v978_v63 = vpop.f32.mrf.mxu3  ;;  %v938_v51 = vpop.f32.mrf.mxu1 }
 0x371   :  { %v1146_v33 = vpop.permute.xlu1 %1145  ;;  %v1176_v45 = vpop.permute.xlu0 %1175  ;;  %vm1197_vm0 = vcmp.ne.f32.partialorder %v71_v39, 0.0  ;;  %v1154_v49 = vperm.slane %v2256_v1, 6  ;;  %vm1223_vm9 = vcmp.eq.s32.totalorder %v1219_v19, 1  ;;  %vm2579_vm13 = vcmp.eq.s32.totalorder %v1098_v34, 1 }
 0x372   :  { %v1149_v23 = vsel %vm350_vm6, %v1146_v33, %v1148_v5  ;;  %v1180_v46 = vsel %vm386_vm8, %v1176_v45, %v2237_v22  ;;  %v1168_v15 = vmax.f32 %v1140_v44, %v1164_v9  ;;  %v1177_v25 = vsel %vm386_vm8, %v1174_v62, %v1176_v45  ;;  %v918_v9 = vpop.f32.mrf.mxu0 }
 0x373   :  { %v1163_v21 = vsel %vm2551_vm14, %v1149_v23, -3e+38  ;;  %v1192_v26 = vsel %vm2555_vm1, %v1180_v46, -3e+38  ;;  %v1191_v41 = vsel %vm1187_vm2, %v1177_v25, -3e+38  ;;  %v959_v6 = vadd.f32 %v958_v30, %v2233_v37 }
 0x374   :  { %v1196_v52 = vmax.f32 %v1168_v15, %v1192_v26  ;;  %v1167_v53 = vmax.f32 %v1139_v43, %v1163_v21  ;;  %v1216_v54 = vsel %vm1200_vm11, 1, %v2676_v47  ;;  %v1214_v32 = vsel %vm1198_vm15, 1, %v2676_v47 }
 0x375   :  { %v1213_v59 = vsel %vm1197_vm0, 1, %v2676_v47  ;;  %vm2589_vm3 = vcmp.eq.s32.totalorder %v1126_v35, 1  ;;  %v1122_v31 = vsel %vm302_vm5, %v2338_v0, %v2499_v28  ;;  %vm2597_vm4 = vcmp.eq.s32.totalorder %v1154_v49, 1 }
 0x376   :  { %v1195_v57 = vmax.f32 %v1167_v53, %v1191_v41  ;;  %v1220_v58 = vperm.slane %v1216_v54, 0  ;;  %v1181_v47 = vperm.slane %v2287_v24, 7  ;;  %v1150_v42 = vsel %vm350_vm6, %v2249_v3, %v1146_v33  ;;  %v1204_v24 = vpop.permute.xlu2 %1203 }
 0x377   :  { %v1218_v61 = vperm.slane %v1214_v32, 0  ;;  %v1217_v16 = vperm.slane %v1213_v59, 0  ;;  %v1182_v20 = vperm.slane %v2256_v1, 7  ;;  %v1106_v0 = vsel %vm2579_vm13, %v2175_v18, -3e+38 }
 0x378   :  { %v1134_v28 = vsel %vm2589_vm3, %v1122_v31, -3e+38  ;;  %v1110_v60 = vmax.f32 %v2322_v10, %v1106_v0  ;;  %v1162_v4 = vsel %vm2597_vm4, %v1150_v42, -3e+38  ;;  %vm2614_vm5 = vcmp.eq.s32.totalorder %v1220_v58, 1 }
 0x379   :  { %v1208_v40 = vpop.permute.xlu1 %1207  ;;  %v1206_v5 = vpop.permute.xlu0 %1205  ;;  %vm2618_vm6 = vcmp.eq.s32.totalorder %v1181_v47, 1  ;;  %vm2622_vm12 = vcmp.eq.s32.totalorder %v1218_v61, 1  ;;  %vm2626_vm10 = vcmp.eq.s32.totalorder %v1217_v16, 1  ;;  %vm2630_vm14 = vcmp.eq.s32.totalorder %v1182_v20, 1 }
 0x37a   :  { %v1209_v8 = vsel %vm434_vm7, %v1206_v5, %v1208_v40  ;;  %v1138_v18 = vmax.f32 %v1110_v60, %v1134_v28  ;;  %v1210_v7 = vsel %vm434_vm7, %v1204_v24, %v1206_v5  ;;  %v979_v21 = vadd.f32 %v978_v63, %v2233_v37 }
 0x37b   :  { %v1227_v29 = vsel %vm1223_vm9, %v1209_v8, -3e+38  ;;  %v919_v26 = vadd.f32 %v918_v9, %v2233_v37  ;;  %v1226_v19 = vsel %vm2622_vm12, %v1210_v7, -3e+38  ;;  %v939_v53 = vadd.f32 %v938_v51, %v2233_v37 }
 0x37c   :  { %v1231_v36 = vmax.f32 %v1195_v57, %v1227_v29  ;;  %v1166_v23 = vmax.f32 %v1138_v18, %v1162_v4 }
 0x37e   :  { %v1235_v50 = vadd.f32 %v1231_v36, %v959_v6 }
 0x380   :  { %1357 = vmatmul.f32.vlgmr.msrb.gmra.mxu2 %v1235_v50 }
 0x381   :  { %v1202_v13 = vpop.permute.xlu1 %1201  ;;  %v1172_v38 = vpop.permute.xlu0 %1171 }
 0x382   :  { %v1211_v45 = vsel %vm434_vm7, %v1202_v13, %v1204_v24  ;;  %v1212_v44 = vsel %vm434_vm7, %v1208_v40, %v1202_v13  ;;  %v1178_v11 = vsel %vm386_vm8, %v1172_v38, %v1174_v62  ;;  %v1179_v17 = vsel %vm386_vm8, %v2237_v22, %v1172_v38 }
 0x383   :  { %v1228_v46 = vsel %vm2614_vm5, %v1212_v44, -3e+38  ;;  %v1189_v39 = vsel %vm2618_vm6, %v1179_v17, -3e+38  ;;  %v1190_v27 = vsel %vm2630_vm14, %v1178_v11, -3e+38 }
 0x384   :  { %v1232_v15 = vmax.f32 %v1196_v52, %v1228_v46  ;;  %v1193_v22 = vmax.f32 %v2526_v48, %v1189_v39  ;;  %v1225_v43 = vsel %vm2626_vm10, %v1211_v45, -3e+38  ;;  %v1194_v56 = vmax.f32 %v1166_v23, %v1190_v27 }
 0x386   :  { %v1236_v62 = vadd.f32 %v1232_v15, %v979_v21  ;;  %v1229_v34 = vmax.f32 %v1193_v22, %v1225_v43  ;;  %v1230_v25 = vmax.f32 %v1194_v56, %v1226_v19 }
 0x388   :  { %1377 = vmatmul.f32.vlgmr.msrb.gmra.mxu3 %v1236_v62  ;;  %v1233_v52 = vadd.f32 %v1229_v34, %v919_v26  ;;  %v1234_v35 = vadd.f32 %v1230_v25, %v939_v53 }
 0x38a   :  { %1317 = vmatmul.f32.vlgmr.msrb.gmra.mxu0 %v1233_v52  ;;  %1337 = vmatmul.f32.vlgmr.msrb.gmra.mxu1 %v1234_v35 }
 0x403   :  { %v1358_v2 = vpop.f32.mrf.mxu2 }
 0x407   :  { %v1318_v48 = vpop.f32.mrf.mxu0  ;;  %v1338_v30 = vpop.f32.mrf.mxu1 }
 0x408   :  { %v1339_v49 = vadd.f32 %v1338_v30, %v1318_v48 }
 0x40a   :  { %v1359_v41 = vadd.f32 %v1358_v2, %v1339_v49 }
 0x40b   :  { %v1378_v40 = vpop.f32.mrf.mxu3 }
 0x40c   :  { %v1379_v5 = vadd.f32 %v1378_v40, %v1359_v41 }
 0x40e   :  { %1381 = vst [vmem:[#allocation8] sm:$0xff] %v1379_v5 }
 0x40f   :  { %1392 = dma.vmem_to_hbm [thread:$0]  %s1388_s18, 128, %s1390_s21, [#allocation5]  }
 0x410   :  { %1522 = dma.done.wait [#allocation5], 128  }
 0x411   :  { %1523 = vsyncadd [#allocation5], 4294967168 }
 0x412   :  { %1397 = vsyncpa [#allocation4], 1 }
 0x413   :  { %1398 = vsyncpa [#allocation7], 1 }
 0x414   :  { %1399 = vsyncpa [#allocation5], 1 }

</bundles_post_ra>
